<compile_context>
chip_gen: v6e
topology: v6e:2x2x1
jax: 0.10.0
libtpu: 0.0.40
codegen_flags: <defaults>
</compile_context>

<pallas_src>
import jax
import jax.numpy as jnp
from jax import lax
from jax.experimental import pallas as pl
from jax.experimental.pallas import tpu as pltpu


# ----------------------------------------------------------------------------- recurrence kernel
def gru_decoder_kernel(gx0_ref, h0_ref,
                       whh0_ref, bhh0_ref,
                       wih1_ref, bih1_ref, whh1_ref, bhh1_ref,
                       h1_all_ref, state_ref):
    """2-layer GRU recurrence over all timesteps in one grid point.

    gx0_ref : [S, B, 3H]  precomputed layer-0 x-path gate pre-activations (incl. context + bih0)
    h0_ref  : [L=2, B, H] initial hidden state
    whh0/wih1/whh1 : [H, 3H] fused gate weights; bhh0/bih1/bhh1 : [1, 3H] fused biases
    h1_all_ref : [S, B, H]  top-layer hidden state per timestep (fed to the vocab projection)
    state_ref  : [L=2, B, H] final hidden state
    """
    S = gx0_ref.shape[0]
    H = h0_ref.shape[-1]

    # Load all weights/biases once; they stay in vregs/VMEM for the whole recurrence.
    whh0 = whh0_ref[...]
    bhh0 = bhh0_ref[...]
    wih1 = wih1_ref[...]
    bih1 = bih1_ref[...]
    whh1 = whh1_ref[...]
    bhh1 = bhh1_ref[...]

    def fused_gates(gx, gh, h_prev):
        # gx, gh: [B, 3H] with gate order [r | z | n] along the lane axis.
        r = jax.nn.sigmoid(gx[:, :H] + gh[:, :H])
        z = jax.nn.sigmoid(gx[:, H:2 * H] + gh[:, H:2 * H])
        n = jnp.tanh(gx[:, 2 * H:] + r * gh[:, 2 * H:])     # bhh_n lives inside gh -> r * bhh_n, matches torch
        return (1.0 - z) * n + z * h_prev

    def step(t, carry):
        h0, h1 = carry
        # ---- layer 0: x-path already precomputed, only the h-path dot remains.
        gx0 = gx0_ref[t]                                                        # [B, 3H]
        gh0 = jnp.dot(h0, whh0, preferred_element_type=jnp.float32) + bhh0      # [B, 3H]
        h0_new = fused_gates(gx0, gh0, h0)
        # ---- layer 1: both paths depend on recurrent values.
        gx1 = jnp.dot(h0_new, wih1, preferred_element_type=jnp.float32) + bih1
        gh1 = jnp.dot(h1, whh1, preferred_element_type=jnp.float32) + bhh1
        h1_new = fused_gates(gx1, gh1, h1)

        h1_all_ref[t] = h1_new.astype(h1_all_ref.dtype)
        return (h0_new, h1_new)

    h0_final, h1_final = lax.fori_loop(0, S, step, (h0_ref[0], h0_ref[1]), unroll=True)

    # Final state written exactly once (previously rewritten every timestep).
    state_ref[0] = h0_final.astype(state_ref.dtype)
    state_ref[1] = h1_final.astype(state_ref.dtype)


# ----------------------------------------------------------------------------- vocab projection
def vocab_proj_kernel(h_ref, w_ref, b_ref, o_ref):
    o_ref[...] = (jnp.dot(h_ref[...], w_ref[...], preferred_element_type=jnp.float32)
                  + b_ref[...]).astype(o_ref.dtype)


def vocab_projection(h_flat, wout, bout):
    """One lane-dense matmul over all (S*B) rows: [N, H] @ [H, V] + [1, V]."""
    N, H = h_flat.shape
    V = wout.shape[1]
    # Row tiling: single block at toy sizes; chunk rows when N is large and tileable.
    tm = 256 if (N > 256 and N % 256 == 0) else N
    # TODO(synk): for realistic V (e.g. 32k) add a "parallel" grid axis over V tiles (multiple of
    # 128) and budget for v7x's 64 MiB VMEM via pltpu.CompilerParams(vmem_limit_bytes=...).
    return pl.pallas_call(
        vocab_proj_kernel,
        out_shape=jax.ShapeDtypeStruct((N, V), jnp.float32),
        grid_spec=pltpu.PrefetchScalarGridSpec(
            num_scalar_prefetch=0,
            grid=(N // tm,),
            in_specs=[pl.BlockSpec((tm, H), lambda i: (i, 0)),
                      pl.BlockSpec((H, V), lambda i: (0, 0)),
                      pl.BlockSpec((1, V), lambda i: (0, 0))],
            out_specs=pl.BlockSpec((tm, V), lambda i: (i, 0)),
        ),
        compiler_params=pltpu.CompilerParams(dimension_semantics=("parallel",)),
    )(h_flat, wout, bout)


# ----------------------------------------------------------------------------- forward wrapper
def seq2seq_decoder_forward(X, state, params):
    """X: [B, S] int32 token ids.  state: [2, B, H] float32.
    Returns (logits [B, S, V], state [2, B, H])."""
    emb = params["embedding"][X]                      # [B, S, E]   (embedding gather = XLA glue)
    Xe = jnp.transpose(emb, (1, 0, 2))                # [S, B, E]   (time-major, like nn.GRU)
    S, B, E = Xe.shape
    L, _, H = state.shape
    assert L == 2, "kernel is specialized for the 2-layer GRU of the reference decoder"
    V = params["wout"].shape[1]

    # Hoisted layer-0 x-path: one big [S*B, E] x [E, 3H] matmul, plus the constant context term
    # (state[-1] @ Wih0[E:]) and bih0 folded into a per-batch bias computed once.
    wih0 = params["wih0"]                                                           # [E+H, 3H]
    gx0_const = jnp.dot(state[-1], wih0[E:], preferred_element_type=jnp.float32) \
        + params["bih0"]                                                            # [B, 3H]
    gx0 = (jnp.dot(Xe.reshape(S * B, E), wih0[:E], preferred_element_type=jnp.float32)
           .reshape(S, B, 3 * H) + gx0_const[None])                                 # [S, B, 3H]

    grid_spec = pltpu.PrefetchScalarGridSpec(
        num_scalar_prefetch=0,
        grid=(1,),                                    # recurrence runs as one in-kernel loop
        in_specs=[
            pl.BlockSpec((S, B, 3 * H), lambda i: (0, 0, 0)),   # gx0
            pl.BlockSpec((L, B, H), lambda i: (0, 0, 0)),       # initial hidden state
            pl.BlockSpec((H, 3 * H), lambda i: (0, 0)),         # whh0 (fused)
            pl.BlockSpec((1, 3 * H), lambda i: (0, 0)),         # bhh0 (fused)
            pl.BlockSpec((H, 3 * H), lambda i: (0, 0)),         # wih1 (fused)
            pl.BlockSpec((1, 3 * H), lambda i: (0, 0)),         # bih1 (fused)
            pl.BlockSpec((H, 3 * H), lambda i: (0, 0)),         # whh1 (fused)
            pl.BlockSpec((1, 3 * H), lambda i: (0, 0)),         # bhh1 (fused)
        ],
        out_specs=[
            pl.BlockSpec((S, B, H), lambda i: (0, 0, 0)),       # h1 for every timestep
            pl.BlockSpec((L, B, H), lambda i: (0, 0, 0)),       # final state
        ],
    )

    h1_all, state_out = pl.pallas_call(
        gru_decoder_kernel,
        out_shape=(jax.ShapeDtypeStruct((S, B, H), jnp.float32),
                   jax.ShapeDtypeStruct((L, B, H), jnp.float32)),
        grid_spec=grid_spec,
        compiler_params=pltpu.CompilerParams(dimension_semantics=("arbitrary",)),
    )(gx0, state,
      params["whh0"], params["bhh0"],
      params["wih1"], params["bih1"], params["whh1"], params["bhh1"])

    # Vocab projection: one lane-dense matmul over all S*B rows (out of the recurrence).
    logits = vocab_projection(h1_all.reshape(S * B, H), params["wout"], params["bout"])
    logits = logits.reshape(S, B, V)
    return jnp.transpose(logits, (1, 0, 2)), state_out        # output.permute(1, 0, 2)


# ----------------------------------------------------------------------------- pure-JAX reference
def ref_forward(X, state, params):
    """Faithful per-timestep reference (PyTorch GRU semantics, fused [in, 3H] weight layout)."""
    emb = params["embedding"][X]
    Xe = jnp.transpose(emb, (1, 0, 2))
    S, B, E = Xe.shape
    H = state.shape[-1]
    ctx = jnp.broadcast_to(state[-1][None], (S, B, H))        # state[-1].repeat(S, 1, 1)
    x = jnp.concatenate([Xe, ctx], axis=2)                    # [S, B, E+H]

    def cell(inp, h_prev, wih, whh, bih, bhh):
        gx = inp @ wih + bih
        gh = h_prev @ whh + bhh
        r = jax.nn.sigmoid(gx[:, :H] + gh[:, :H])
        z = jax.nn.sigmoid(gx[:, H:2 * H] + gh[:, H:2 * H])
        n = jnp.tanh(gx[:, 2 * H:] + r * gh[:, 2 * H:])
        return (1.0 - z) * n + z * h_prev

    h0, h1 = state[0], state[1]
    outs = []
    for t in range(S):
        h0 = cell(x[t], h0, params["wih0"], params["whh0"], params["bih0"], params["bhh0"])
        h1 = cell(h0, h1, params["wih1"], params["whh1"], params["bih1"], params["bhh1"])
        outs.append(h1 @ params["wout"] + params["bout"])
    out = jnp.stack(outs)                                     # [S, B, V]
    return jnp.transpose(out, (1, 0, 2)), jnp.stack([h0, h1])


# ----------------------------------------------------------------------------- params
def init_params(key, vocab_size, embed_size, hidden_size):
    ks = jax.random.split(key, 12)
    s = 1.0 / jnp.sqrt(hidden_size)
    u = lambda k, shape: jax.random.uniform(k, shape, jnp.float32, -s, s)
    H3 = 3 * hidden_size
    return {
        "embedding": jax.random.normal(ks[0], (vocab_size, embed_size), jnp.float32),
        # GRU layer 0 (input = embed + hidden), fused gate order [r | z | n] along last axis
        "wih0": u(ks[1], (embed_size + hidden_size, H3)),
        "whh0": u(ks[2], (hidden_size, H3)),
        "bih0": u(ks[3], (1, H3)),
        "bhh0": u(ks[4], (1, H3)),
        # GRU layer 1 (input = hidden)
        "wih1": u(ks[5], (hidden_size, H3)),
        "whh1": u(ks[6], (hidden_size, H3)),
        "bih1": u(ks[7], (1, H3)),
        "bhh1": u(ks[8], (1, H3)),
        # output linear: hidden -> vocab
        "wout": u(ks[9], (hidden_size, vocab_size)),
        "bout": u(ks[10], (1, vocab_size)),
    }


if __name__ == "__main__":
    vocab_size, embed_size, hidden_size, num_layers = 32, 16, 32, 2
    batch, seq = 4, 8

    key = jax.random.PRNGKey(0)
    kp, kx, kh = jax.random.split(key, 3)
    params = init_params(kp, vocab_size, embed_size, hidden_size)
    X = jax.random.randint(kx, (batch, seq), 0, vocab_size, dtype=jnp.int32)
    state = jax.random.normal(kh, (num_layers, batch, hidden_size), jnp.float32)

    logits, state_out = jax.block_until_ready(seq2seq_decoder_forward(X, state, params))
    logits_ref, state_ref = ref_forward(X, state, params)

    assert logits.shape == (batch, seq, vocab_size)
    assert state_out.shape == (num_layers, batch, hidden_size)
    assert jnp.allclose(logits, logits_ref, atol=2e-3, rtol=2e-3)
    assert jnp.allclose(state_out, state_ref, atol=2e-3, rtol=2e-3)

    print("KERNEL_OK")
</pallas_src>

<mosaic_0001>
module attributes {stable_mosaic.version = 11 : i64} {
  func.func @gru_decoder_kernel(%arg0: i32, %arg1: memref<8x4x96xf32, #tpu.memory_space<vmem>>, %arg2: memref<2x4x32xf32, #tpu.memory_space<vmem>>, %arg3: memref<32x96xf32, #tpu.memory_space<vmem>>, %arg4: memref<1x96xf32, #tpu.memory_space<vmem>>, %arg5: memref<32x96xf32, #tpu.memory_space<vmem>>, %arg6: memref<1x96xf32, #tpu.memory_space<vmem>>, %arg7: memref<32x96xf32, #tpu.memory_space<vmem>>, %arg8: memref<1x96xf32, #tpu.memory_space<vmem>>, %arg9: memref<8x4x32xf32, #tpu.memory_space<vmem>>, %arg10: memref<2x4x32xf32, #tpu.memory_space<vmem>>) attributes {dimension_semantics = [#tpu.dimension_semantics<arbitrary>], iteration_bounds = array<i64: 1>, scalar_prefetch = 0 : i64, scratch_operands = 0 : i64, tpu.core_type = #tpu.core_type<tc>, window_params = [{pipeline_mode = #tpu.pipeline_mode<synchronous>, transform_indices = @transform_0, window_bounds = array<i64: 8, 4, 96>}, {pipeline_mode = #tpu.pipeline_mode<synchronous>, transform_indices = @transform_1, window_bounds = array<i64: 2, 4, 32>}, {pipeline_mode = #tpu.pipeline_mode<synchronous>, transform_indices = @transform_2, window_bounds = array<i64: 32, 96>}, {pipeline_mode = #tpu.pipeline_mode<synchronous>, transform_indices = @transform_3, window_bounds = array<i64: 1, 96>}, {pipeline_mode = #tpu.pipeline_mode<synchronous>, transform_indices = @transform_4, window_bounds = array<i64: 32, 96>}, {pipeline_mode = #tpu.pipeline_mode<synchronous>, transform_indices = @transform_5, window_bounds = array<i64: 1, 96>}, {pipeline_mode = #tpu.pipeline_mode<synchronous>, transform_indices = @transform_6, window_bounds = array<i64: 32, 96>}, {pipeline_mode = #tpu.pipeline_mode<synchronous>, transform_indices = @transform_7, window_bounds = array<i64: 1, 96>}, {pipeline_mode = #tpu.pipeline_mode<synchronous>, transform_indices = @transform_8, window_bounds = array<i64: 8, 4, 32>}, {pipeline_mode = #tpu.pipeline_mode<synchronous>, transform_indices = @transform_9, window_bounds = array<i64: 2, 4, 32>}]} {
    %c0 = arith.constant 0 : index
    %c0_0 = arith.constant 0 : index
    %0 = vector.load %arg3[%c0, %c0_0] : memref<32x96xf32, #tpu.memory_space<vmem>>, vector<32x96xf32>
    %c0_1 = arith.constant 0 : index
    %c0_2 = arith.constant 0 : index
    %1 = vector.load %arg4[%c0_1, %c0_2] : memref<1x96xf32, #tpu.memory_space<vmem>>, vector<1x96xf32>
    %c0_3 = arith.constant 0 : index
    %c0_4 = arith.constant 0 : index
    %2 = vector.load %arg5[%c0_3, %c0_4] : memref<32x96xf32, #tpu.memory_space<vmem>>, vector<32x96xf32>
    %c0_5 = arith.constant 0 : index
    %c0_6 = arith.constant 0 : index
    %3 = vector.load %arg6[%c0_5, %c0_6] : memref<1x96xf32, #tpu.memory_space<vmem>>, vector<1x96xf32>
    %c0_7 = arith.constant 0 : index
    %c0_8 = arith.constant 0 : index
    %4 = vector.load %arg7[%c0_7, %c0_8] : memref<32x96xf32, #tpu.memory_space<vmem>>, vector<32x96xf32>
    %c0_9 = arith.constant 0 : index
    %c0_10 = arith.constant 0 : index
    %5 = vector.load %arg8[%c0_9, %c0_10] : memref<1x96xf32, #tpu.memory_space<vmem>>, vector<1x96xf32>
    %c0_11 = arith.constant 0 : index
    %c0_12 = arith.constant 0 : index
    %c0_13 = arith.constant 0 : index
    %6 = vector.load %arg2[%c0_11, %c0_12, %c0_13] : memref<2x4x32xf32, #tpu.memory_space<vmem>>, vector<1x4x32xf32>
    %7 = vector.shape_cast %6 : vector<1x4x32xf32> to vector<4x32xf32>
    %c1 = arith.constant 1 : index
    %c0_14 = arith.constant 0 : index
    %c0_15 = arith.constant 0 : index
    %8 = vector.load %arg2[%c1, %c0_14, %c0_15] : memref<2x4x32xf32, #tpu.memory_space<vmem>>, vector<1x4x32xf32>
    %9 = vector.shape_cast %8 : vector<1x4x32xf32> to vector<4x32xf32>
    %c0_i32 = arith.constant 0 : i32
    %10 = arith.index_cast %c0_i32 : i32 to index
    %c0_16 = arith.constant 0 : index
    %c0_17 = arith.constant 0 : index
    %11 = vector.load %arg1[%10, %c0_16, %c0_17] : memref<8x4x96xf32, #tpu.memory_space<vmem>>, vector<1x4x96xf32>
    %12 = vector.shape_cast %11 : vector<1x4x96xf32> to vector<4x96xf32>
    %cst = arith.constant dense<0.000000e+00> : vector<4x96xf32>
    %13 = tpu.matmul %7, %0, %cst {dimension_numbers = #tpu.dot_dimension_numbers<[1], [0], [0], [1], [0, 0, 1, 1], [], []>} : vector<4x32xf32>, vector<32x96xf32>, vector<4x96xf32> -> vector<4x96xf32>
    %14 = vector.broadcast %1 : vector<1x96xf32> to vector<4x96xf32>
    %15 = arith.addf %13, %14 : vector<4x96xf32>
    %16 = vector.extract_strided_slice %12 {offsets = [0, 0], sizes = [4, 32], strides = [1, 1]} : vector<4x96xf32> to vector<4x32xf32>
    %17 = vector.extract_strided_slice %15 {offsets = [0, 0], sizes = [4, 32], strides = [1, 1]} : vector<4x96xf32> to vector<4x32xf32>
    %18 = arith.addf %16, %17 : vector<4x32xf32>
    %19 = arith.negf %18 : vector<4x32xf32>
    %20 = math.exp %19 : vector<4x32xf32>
    %cst_18 = arith.constant 1.000000e+00 : f32
    %21 = vector.broadcast %cst_18 : f32 to vector<4x32xf32>
    %22 = arith.addf %21, %20 : vector<4x32xf32>
    %23 = arith.divf %21, %22 : vector<4x32xf32>
    %24 = vector.extract_strided_slice %12 {offsets = [0, 32], sizes = [4, 32], strides = [1, 1]} : vector<4x96xf32> to vector<4x32xf32>
    %25 = vector.extract_strided_slice %15 {offsets = [0, 32], sizes = [4, 32], strides = [1, 1]} : vector<4x96xf32> to vector<4x32xf32>
    %26 = arith.addf %24, %25 : vector<4x32xf32>
    %27 = arith.negf %26 : vector<4x32xf32>
    %28 = math.exp %27 : vector<4x32xf32>
    %cst_19 = arith.constant 1.000000e+00 : f32
    %29 = vector.broadcast %cst_19 : f32 to vector<4x32xf32>
    %30 = arith.addf %29, %28 : vector<4x32xf32>
    %31 = arith.divf %29, %30 : vector<4x32xf32>
    %32 = vector.extract_strided_slice %12 {offsets = [0, 64], sizes = [4, 32], strides = [1, 1]} : vector<4x96xf32> to vector<4x32xf32>
    %33 = vector.extract_strided_slice %15 {offsets = [0, 64], sizes = [4, 32], strides = [1, 1]} : vector<4x96xf32> to vector<4x32xf32>
    %34 = arith.mulf %23, %33 : vector<4x32xf32>
    %35 = arith.addf %32, %34 : vector<4x32xf32>
    %36 = math.tanh %35 : vector<4x32xf32>
    %cst_20 = arith.constant 1.000000e+00 : f32
    %37 = vector.broadcast %cst_20 : f32 to vector<4x32xf32>
    %38 = arith.subf %37, %31 : vector<4x32xf32>
    %39 = arith.mulf %38, %36 : vector<4x32xf32>
    %40 = arith.mulf %31, %7 : vector<4x32xf32>
    %41 = arith.addf %39, %40 : vector<4x32xf32>
    %cst_21 = arith.constant dense<0.000000e+00> : vector<4x96xf32>
    %42 = tpu.matmul %41, %2, %cst_21 {dimension_numbers = #tpu.dot_dimension_numbers<[1], [0], [0], [1], [0, 0, 1, 1], [], []>} : vector<4x32xf32>, vector<32x96xf32>, vector<4x96xf32> -> vector<4x96xf32>
    %43 = vector.broadcast %3 : vector<1x96xf32> to vector<4x96xf32>
    %44 = arith.addf %42, %43 : vector<4x96xf32>
    %cst_22 = arith.constant dense<0.000000e+00> : vector<4x96xf32>
    %45 = tpu.matmul %9, %4, %cst_22 {dimension_numbers = #tpu.dot_dimension_numbers<[1], [0], [0], [1], [0, 0, 1, 1], [], []>} : vector<4x32xf32>, vector<32x96xf32>, vector<4x96xf32> -> vector<4x96xf32>
    %46 = vector.broadcast %5 : vector<1x96xf32> to vector<4x96xf32>
    %47 = arith.addf %45, %46 : vector<4x96xf32>
    %48 = vector.extract_strided_slice %44 {offsets = [0, 0], sizes = [4, 32], strides = [1, 1]} : vector<4x96xf32> to vector<4x32xf32>
    %49 = vector.extract_strided_slice %47 {offsets = [0, 0], sizes = [4, 32], strides = [1, 1]} : vector<4x96xf32> to vector<4x32xf32>
    %50 = arith.addf %48, %49 : vector<4x32xf32>
    %51 = arith.negf %50 : vector<4x32xf32>
    %52 = math.exp %51 : vector<4x32xf32>
    %cst_23 = arith.constant 1.000000e+00 : f32
    %53 = vector.broadcast %cst_23 : f32 to vector<4x32xf32>
    %54 = arith.addf %53, %52 : vector<4x32xf32>
    %55 = arith.divf %53, %54 : vector<4x32xf32>
    %56 = vector.extract_strided_slice %44 {offsets = [0, 32], sizes = [4, 32], strides = [1, 1]} : vector<4x96xf32> to vector<4x32xf32>
    %57 = vector.extract_strided_slice %47 {offsets = [0, 32], sizes = [4, 32], strides = [1, 1]} : vector<4x96xf32> to vector<4x32xf32>
    %58 = arith.addf %56, %57 : vector<4x32xf32>
    %59 = arith.negf %58 : vector<4x32xf32>
    %60 = math.exp %59 : vector<4x32xf32>
    %cst_24 = arith.constant 1.000000e+00 : f32
    %61 = vector.broadcast %cst_24 : f32 to vector<4x32xf32>
    %62 = arith.addf %61, %60 : vector<4x32xf32>
    %63 = arith.divf %61, %62 : vector<4x32xf32>
    %64 = vector.extract_strided_slice %44 {offsets = [0, 64], sizes = [4, 32], strides = [1, 1]} : vector<4x96xf32> to vector<4x32xf32>
    %65 = vector.extract_strided_slice %47 {offsets = [0, 64], sizes = [4, 32], strides = [1, 1]} : vector<4x96xf32> to vector<4x32xf32>
    %66 = arith.mulf %55, %65 : vector<4x32xf32>
    %67 = arith.addf %64, %66 : vector<4x32xf32>
    %68 = math.tanh %67 : vector<4x32xf32>
    %cst_25 = arith.constant 1.000000e+00 : f32
    %69 = vector.broadcast %cst_25 : f32 to vector<4x32xf32>
    %70 = arith.subf %69, %63 : vector<4x32xf32>
    %71 = arith.mulf %70, %68 : vector<4x32xf32>
    %72 = arith.mulf %63, %9 : vector<4x32xf32>
    %73 = arith.addf %71, %72 : vector<4x32xf32>
    %74 = arith.index_cast %c0_i32 : i32 to index
    %c0_26 = arith.constant 0 : index
    %c0_27 = arith.constant 0 : index
    %75 = vector.load %arg9[%74, %c0_26, %c0_27] : memref<8x4x32xf32, #tpu.memory_space<vmem>>, vector<1x4x32xf32>
    %76 = vector.shape_cast %75 : vector<1x4x32xf32> to vector<4x32xf32>
    %77 = vector.shape_cast %73 : vector<4x32xf32> to vector<1x4x32xf32>
    tpu.vector_store %arg9[%74, %c0_26, %c0_27], %77 {strides = array<i32>} : memref<8x4x32xf32, #tpu.memory_space<vmem>>, vector<1x4x32xf32>,
    %c1_i32 = arith.constant 1 : i32
    %78 = arith.index_cast %c1_i32 : i32 to index
    %c0_28 = arith.constant 0 : index
    %c0_29 = arith.constant 0 : index
    %79 = vector.load %arg1[%78, %c0_28, %c0_29] : memref<8x4x96xf32, #tpu.memory_space<vmem>>, vector<1x4x96xf32>
    %80 = vector.shape_cast %79 : vector<1x4x96xf32> to vector<4x96xf32>
    %cst_30 = arith.constant dense<0.000000e+00> : vector<4x96xf32>
    %81 = tpu.matmul %41, %0, %cst_30 {dimension_numbers = #tpu.dot_dimension_numbers<[1], [0], [0], [1], [0, 0, 1, 1], [], []>} : vector<4x32xf32>, vector<32x96xf32>, vector<4x96xf32> -> vector<4x96xf32>
    %82 = vector.broadcast %1 : vector<1x96xf32> to vector<4x96xf32>
    %83 = arith.addf %81, %82 : vector<4x96xf32>
    %84 = vector.extract_strided_slice %80 {offsets = [0, 0], sizes = [4, 32], strides = [1, 1]} : vector<4x96xf32> to vector<4x32xf32>
    %85 = vector.extract_strided_slice %83 {offsets = [0, 0], sizes = [4, 32], strides = [1, 1]} : vector<4x96xf32> to vector<4x32xf32>
    %86 = arith.addf %84, %85 : vector<4x32xf32>
    %87 = arith.negf %86 : vector<4x32xf32>
    %88 = math.exp %87 : vector<4x32xf32>
    %cst_31 = arith.constant 1.000000e+00 : f32
    %89 = vector.broadcast %cst_31 : f32 to vector<4x32xf32>
    %90 = arith.addf %89, %88 : vector<4x32xf32>
    %91 = arith.divf %89, %90 : vector<4x32xf32>
    %92 = vector.extract_strided_slice %80 {offsets = [0, 32], sizes = [4, 32], strides = [1, 1]} : vector<4x96xf32> to vector<4x32xf32>
    %93 = vector.extract_strided_slice %83 {offsets = [0, 32], sizes = [4, 32], strides = [1, 1]} : vector<4x96xf32> to vector<4x32xf32>
    %94 = arith.addf %92, %93 : vector<4x32xf32>
    %95 = arith.negf %94 : vector<4x32xf32>
    %96 = math.exp %95 : vector<4x32xf32>
    %cst_32 = arith.constant 1.000000e+00 : f32
    %97 = vector.broadcast %cst_32 : f32 to vector<4x32xf32>
    %98 = arith.addf %97, %96 : vector<4x32xf32>
    %99 = arith.divf %97, %98 : vector<4x32xf32>
    %100 = vector.extract_strided_slice %80 {offsets = [0, 64], sizes = [4, 32], strides = [1, 1]} : vector<4x96xf32> to vector<4x32xf32>
    %101 = vector.extract_strided_slice %83 {offsets = [0, 64], sizes = [4, 32], strides = [1, 1]} : vector<4x96xf32> to vector<4x32xf32>
    %102 = arith.mulf %91, %101 : vector<4x32xf32>
    %103 = arith.addf %100, %102 : vector<4x32xf32>
    %104 = math.tanh %103 : vector<4x32xf32>
    %cst_33 = arith.constant 1.000000e+00 : f32
    %105 = vector.broadcast %cst_33 : f32 to vector<4x32xf32>
    %106 = arith.subf %105, %99 : vector<4x32xf32>
    %107 = arith.mulf %106, %104 : vector<4x32xf32>
    %108 = arith.mulf %99, %41 : vector<4x32xf32>
    %109 = arith.addf %107, %108 : vector<4x32xf32>
    %cst_34 = arith.constant dense<0.000000e+00> : vector<4x96xf32>
    %110 = tpu.matmul %109, %2, %cst_34 {dimension_numbers = #tpu.dot_dimension_numbers<[1], [0], [0], [1], [0, 0, 1, 1], [], []>} : vector<4x32xf32>, vector<32x96xf32>, vector<4x96xf32> -> vector<4x96xf32>
    %111 = vector.broadcast %3 : vector<1x96xf32> to vector<4x96xf32>
    %112 = arith.addf %110, %111 : vector<4x96xf32>
    %cst_35 = arith.constant dense<0.000000e+00> : vector<4x96xf32>
    %113 = tpu.matmul %73, %4, %cst_35 {dimension_numbers = #tpu.dot_dimension_numbers<[1], [0], [0], [1], [0, 0, 1, 1], [], []>} : vector<4x32xf32>, vector<32x96xf32>, vector<4x96xf32> -> vector<4x96xf32>
    %114 = vector.broadcast %5 : vector<1x96xf32> to vector<4x96xf32>
    %115 = arith.addf %113, %114 : vector<4x96xf32>
    %116 = vector.extract_strided_slice %112 {offsets = [0, 0], sizes = [4, 32], strides = [1, 1]} : vector<4x96xf32> to vector<4x32xf32>
    %117 = vector.extract_strided_slice %115 {offsets = [0, 0], sizes = [4, 32], strides = [1, 1]} : vector<4x96xf32> to vector<4x32xf32>
    %118 = arith.addf %116, %117 : vector<4x32xf32>
    %119 = arith.negf %118 : vector<4x32xf32>
    %120 = math.exp %119 : vector<4x32xf32>
    %cst_36 = arith.constant 1.000000e+00 : f32
    %121 = vector.broadcast %cst_36 : f32 to vector<4x32xf32>
    %122 = arith.addf %121, %120 : vector<4x32xf32>
    %123 = arith.divf %121, %122 : vector<4x32xf32>
    %124 = vector.extract_strided_slice %112 {offsets = [0, 32], sizes = [4, 32], strides = [1, 1]} : vector<4x96xf32> to vector<4x32xf32>
    %125 = vector.extract_strided_slice %115 {offsets = [0, 32], sizes = [4, 32], strides = [1, 1]} : vector<4x96xf32> to vector<4x32xf32>
    %126 = arith.addf %124, %125 : vector<4x32xf32>
    %127 = arith.negf %126 : vector<4x32xf32>
    %128 = math.exp %127 : vector<4x32xf32>
    %cst_37 = arith.constant 1.000000e+00 : f32
    %129 = vector.broadcast %cst_37 : f32 to vector<4x32xf32>
    %130 = arith.addf %129, %128 : vector<4x32xf32>
    %131 = arith.divf %129, %130 : vector<4x32xf32>
    %132 = vector.extract_strided_slice %112 {offsets = [0, 64], sizes = [4, 32], strides = [1, 1]} : vector<4x96xf32> to vector<4x32xf32>
    %133 = vector.extract_strided_slice %115 {offsets = [0, 64], sizes = [4, 32], strides = [1, 1]} : vector<4x96xf32> to vector<4x32xf32>
    %134 = arith.mulf %123, %133 : vector<4x32xf32>
    %135 = arith.addf %132, %134 : vector<4x32xf32>
    %136 = math.tanh %135 : vector<4x32xf32>
    %cst_38 = arith.constant 1.000000e+00 : f32
    %137 = vector.broadcast %cst_38 : f32 to vector<4x32xf32>
    %138 = arith.subf %137, %131 : vector<4x32xf32>
    %139 = arith.mulf %138, %136 : vector<4x32xf32>
    %140 = arith.mulf %131, %73 : vector<4x32xf32>
    %141 = arith.addf %139, %140 : vector<4x32xf32>
    %142 = arith.index_cast %c1_i32 : i32 to index
    %c0_39 = arith.constant 0 : index
    %c0_40 = arith.constant 0 : index
    %143 = vector.load %arg9[%142, %c0_39, %c0_40] : memref<8x4x32xf32, #tpu.memory_space<vmem>>, vector<1x4x32xf32>
    %144 = vector.shape_cast %143 : vector<1x4x32xf32> to vector<4x32xf32>
    %145 = vector.shape_cast %141 : vector<4x32xf32> to vector<1x4x32xf32>
    tpu.vector_store %arg9[%142, %c0_39, %c0_40], %145 {strides = array<i32>} : memref<8x4x32xf32, #tpu.memory_space<vmem>>, vector<1x4x32xf32>,
    %c2_i32 = arith.constant 2 : i32
    %146 = arith.index_cast %c2_i32 : i32 to index
    %c0_41 = arith.constant 0 : index
    %c0_42 = arith.constant 0 : index
    %147 = vector.load %arg1[%146, %c0_41, %c0_42] : memref<8x4x96xf32, #tpu.memory_space<vmem>>, vector<1x4x96xf32>
    %148 = vector.shape_cast %147 : vector<1x4x96xf32> to vector<4x96xf32>
    %cst_43 = arith.constant dense<0.000000e+00> : vector<4x96xf32>
    %149 = tpu.matmul %109, %0, %cst_43 {dimension_numbers = #tpu.dot_dimension_numbers<[1], [0], [0], [1], [0, 0, 1, 1], [], []>} : vector<4x32xf32>, vector<32x96xf32>, vector<4x96xf32> -> vector<4x96xf32>
    %150 = vector.broadcast %1 : vector<1x96xf32> to vector<4x96xf32>
    %151 = arith.addf %149, %150 : vector<4x96xf32>
    %152 = vector.extract_strided_slice %148 {offsets = [0, 0], sizes = [4, 32], strides = [1, 1]} : vector<4x96xf32> to vector<4x32xf32>
    %153 = vector.extract_strided_slice %151 {offsets = [0, 0], sizes = [4, 32], strides = [1, 1]} : vector<4x96xf32> to vector<4x32xf32>
    %154 = arith.addf %152, %153 : vector<4x32xf32>
    %155 = arith.negf %154 : vector<4x32xf32>
    %156 = math.exp %155 : vector<4x32xf32>
    %cst_44 = arith.constant 1.000000e+00 : f32
    %157 = vector.broadcast %cst_44 : f32 to vector<4x32xf32>
    %158 = arith.addf %157, %156 : vector<4x32xf32>
    %159 = arith.divf %157, %158 : vector<4x32xf32>
    %160 = vector.extract_strided_slice %148 {offsets = [0, 32], sizes = [4, 32], strides = [1, 1]} : vector<4x96xf32> to vector<4x32xf32>
    %161 = vector.extract_strided_slice %151 {offsets = [0, 32], sizes = [4, 32], strides = [1, 1]} : vector<4x96xf32> to vector<4x32xf32>
    %162 = arith.addf %160, %161 : vector<4x32xf32>
    %163 = arith.negf %162 : vector<4x32xf32>
    %164 = math.exp %163 : vector<4x32xf32>
    %cst_45 = arith.constant 1.000000e+00 : f32
    %165 = vector.broadcast %cst_45 : f32 to vector<4x32xf32>
    %166 = arith.addf %165, %164 : vector<4x32xf32>
    %167 = arith.divf %165, %166 : vector<4x32xf32>
    %168 = vector.extract_strided_slice %148 {offsets = [0, 64], sizes = [4, 32], strides = [1, 1]} : vector<4x96xf32> to vector<4x32xf32>
    %169 = vector.extract_strided_slice %151 {offsets = [0, 64], sizes = [4, 32], strides = [1, 1]} : vector<4x96xf32> to vector<4x32xf32>
    %170 = arith.mulf %159, %169 : vector<4x32xf32>
    %171 = arith.addf %168, %170 : vector<4x32xf32>
    %172 = math.tanh %171 : vector<4x32xf32>
    %cst_46 = arith.constant 1.000000e+00 : f32
    %173 = vector.broadcast %cst_46 : f32 to vector<4x32xf32>
    %174 = arith.subf %173, %167 : vector<4x32xf32>
    %175 = arith.mulf %174, %172 : vector<4x32xf32>
    %176 = arith.mulf %167, %109 : vector<4x32xf32>
    %177 = arith.addf %175, %176 : vector<4x32xf32>
    %cst_47 = arith.constant dense<0.000000e+00> : vector<4x96xf32>
    %178 = tpu.matmul %177, %2, %cst_47 {dimension_numbers = #tpu.dot_dimension_numbers<[1], [0], [0], [1], [0, 0, 1, 1], [], []>} : vector<4x32xf32>, vector<32x96xf32>, vector<4x96xf32> -> vector<4x96xf32>
    %179 = vector.broadcast %3 : vector<1x96xf32> to vector<4x96xf32>
    %180 = arith.addf %178, %179 : vector<4x96xf32>
    %cst_48 = arith.constant dense<0.000000e+00> : vector<4x96xf32>
    %181 = tpu.matmul %141, %4, %cst_48 {dimension_numbers = #tpu.dot_dimension_numbers<[1], [0], [0], [1], [0, 0, 1, 1], [], []>} : vector<4x32xf32>, vector<32x96xf32>, vector<4x96xf32> -> vector<4x96xf32>
    %182 = vector.broadcast %5 : vector<1x96xf32> to vector<4x96xf32>
    %183 = arith.addf %181, %182 : vector<4x96xf32>
    %184 = vector.extract_strided_slice %180 {offsets = [0, 0], sizes = [4, 32], strides = [1, 1]} : vector<4x96xf32> to vector<4x32xf32>
    %185 = vector.extract_strided_slice %183 {offsets = [0, 0], sizes = [4, 32], strides = [1, 1]} : vector<4x96xf32> to vector<4x32xf32>
    %186 = arith.addf %184, %185 : vector<4x32xf32>
    %187 = arith.negf %186 : vector<4x32xf32>
    %188 = math.exp %187 : vector<4x32xf32>
    %cst_49 = arith.constant 1.000000e+00 : f32
    %189 = vector.broadcast %cst_49 : f32 to vector<4x32xf32>
    %190 = arith.addf %189, %188 : vector<4x32xf32>
    %191 = arith.divf %189, %190 : vector<4x32xf32>
    %192 = vector.extract_strided_slice %180 {offsets = [0, 32], sizes = [4, 32], strides = [1, 1]} : vector<4x96xf32> to vector<4x32xf32>
    %193 = vector.extract_strided_slice %183 {offsets = [0, 32], sizes = [4, 32], strides = [1, 1]} : vector<4x96xf32> to vector<4x32xf32>
    %194 = arith.addf %192, %193 : vector<4x32xf32>
    %195 = arith.negf %194 : vector<4x32xf32>
    %196 = math.exp %195 : vector<4x32xf32>
    %cst_50 = arith.constant 1.000000e+00 : f32
    %197 = vector.broadcast %cst_50 : f32 to vector<4x32xf32>
    %198 = arith.addf %197, %196 : vector<4x32xf32>
    %199 = arith.divf %197, %198 : vector<4x32xf32>
    %200 = vector.extract_strided_slice %180 {offsets = [0, 64], sizes = [4, 32], strides = [1, 1]} : vector<4x96xf32> to vector<4x32xf32>
    %201 = vector.extract_strided_slice %183 {offsets = [0, 64], sizes = [4, 32], strides = [1, 1]} : vector<4x96xf32> to vector<4x32xf32>
    %202 = arith.mulf %191, %201 : vector<4x32xf32>
    %203 = arith.addf %200, %202 : vector<4x32xf32>
    %204 = math.tanh %203 : vector<4x32xf32>
    %cst_51 = arith.constant 1.000000e+00 : f32
    %205 = vector.broadcast %cst_51 : f32 to vector<4x32xf32>
    %206 = arith.subf %205, %199 : vector<4x32xf32>
    %207 = arith.mulf %206, %204 : vector<4x32xf32>
    %208 = arith.mulf %199, %141 : vector<4x32xf32>
    %209 = arith.addf %207, %208 : vector<4x32xf32>
    %210 = arith.index_cast %c2_i32 : i32 to index
    %c0_52 = arith.constant 0 : index
    %c0_53 = arith.constant 0 : index
    %211 = vector.load %arg9[%210, %c0_52, %c0_53] : memref<8x4x32xf32, #tpu.memory_space<vmem>>, vector<1x4x32xf32>
    %212 = vector.shape_cast %211 : vector<1x4x32xf32> to vector<4x32xf32>
    %213 = vector.shape_cast %209 : vector<4x32xf32> to vector<1x4x32xf32>
    tpu.vector_store %arg9[%210, %c0_52, %c0_53], %213 {strides = array<i32>} : memref<8x4x32xf32, #tpu.memory_space<vmem>>, vector<1x4x32xf32>,
    %c3_i32 = arith.constant 3 : i32
    %214 = arith.index_cast %c3_i32 : i32 to index
    %c0_54 = arith.constant 0 : index
    %c0_55 = arith.constant 0 : index
    %215 = vector.load %arg1[%214, %c0_54, %c0_55] : memref<8x4x96xf32, #tpu.memory_space<vmem>>, vector<1x4x96xf32>
    %216 = vector.shape_cast %215 : vector<1x4x96xf32> to vector<4x96xf32>
    %cst_56 = arith.constant dense<0.000000e+00> : vector<4x96xf32>
    %217 = tpu.matmul %177, %0, %cst_56 {dimension_numbers = #tpu.dot_dimension_numbers<[1], [0], [0], [1], [0, 0, 1, 1], [], []>} : vector<4x32xf32>, vector<32x96xf32>, vector<4x96xf32> -> vector<4x96xf32>
    %218 = vector.broadcast %1 : vector<1x96xf32> to vector<4x96xf32>
    %219 = arith.addf %217, %218 : vector<4x96xf32>
    %220 = vector.extract_strided_slice %216 {offsets = [0, 0], sizes = [4, 32], strides = [1, 1]} : vector<4x96xf32> to vector<4x32xf32>
    %221 = vector.extract_strided_slice %219 {offsets = [0, 0], sizes = [4, 32], strides = [1, 1]} : vector<4x96xf32> to vector<4x32xf32>
    %222 = arith.addf %220, %221 : vector<4x32xf32>
    %223 = arith.negf %222 : vector<4x32xf32>
    %224 = math.exp %223 : vector<4x32xf32>
    %cst_57 = arith.constant 1.000000e+00 : f32
    %225 = vector.broadcast %cst_57 : f32 to vector<4x32xf32>
    %226 = arith.addf %225, %224 : vector<4x32xf32>
    %227 = arith.divf %225, %226 : vector<4x32xf32>
    %228 = vector.extract_strided_slice %216 {offsets = [0, 32], sizes = [4, 32], strides = [1, 1]} : vector<4x96xf32> to vector<4x32xf32>
    %229 = vector.extract_strided_slice %219 {offsets = [0, 32], sizes = [4, 32], strides = [1, 1]} : vector<4x96xf32> to vector<4x32xf32>
    %230 = arith.addf %228, %229 : vector<4x32xf32>
    %231 = arith.negf %230 : vector<4x32xf32>
    %232 = math.exp %231 : vector<4x32xf32>
    %cst_58 = arith.constant 1.000000e+00 : f32
    %233 = vector.broadcast %cst_58 : f32 to vector<4x32xf32>
    %234 = arith.addf %233, %232 : vector<4x32xf32>
    %235 = arith.divf %233, %234 : vector<4x32xf32>
    %236 = vector.extract_strided_slice %216 {offsets = [0, 64], sizes = [4, 32], strides = [1, 1]} : vector<4x96xf32> to vector<4x32xf32>
    %237 = vector.extract_strided_slice %219 {offsets = [0, 64], sizes = [4, 32], strides = [1, 1]} : vector<4x96xf32> to vector<4x32xf32>
    %238 = arith.mulf %227, %237 : vector<4x32xf32>
    %239 = arith.addf %236, %238 : vector<4x32xf32>
    %240 = math.tanh %239 : vector<4x32xf32>
    %cst_59 = arith.constant 1.000000e+00 : f32
    %241 = vector.broadcast %cst_59 : f32 to vector<4x32xf32>
    %242 = arith.subf %241, %235 : vector<4x32xf32>
    %243 = arith.mulf %242, %240 : vector<4x32xf32>
    %244 = arith.mulf %235, %177 : vector<4x32xf32>
    %245 = arith.addf %243, %244 : vector<4x32xf32>
    %cst_60 = arith.constant dense<0.000000e+00> : vector<4x96xf32>
    %246 = tpu.matmul %245, %2, %cst_60 {dimension_numbers = #tpu.dot_dimension_numbers<[1], [0], [0], [1], [0, 0, 1, 1], [], []>} : vector<4x32xf32>, vector<32x96xf32>, vector<4x96xf32> -> vector<4x96xf32>
    %247 = vector.broadcast %3 : vector<1x96xf32> to vector<4x96xf32>
    %248 = arith.addf %246, %247 : vector<4x96xf32>
    %cst_61 = arith.constant dense<0.000000e+00> : vector<4x96xf32>
    %249 = tpu.matmul %209, %4, %cst_61 {dimension_numbers = #tpu.dot_dimension_numbers<[1], [0], [0], [1], [0, 0, 1, 1], [], []>} : vector<4x32xf32>, vector<32x96xf32>, vector<4x96xf32> -> vector<4x96xf32>
    %250 = vector.broadcast %5 : vector<1x96xf32> to vector<4x96xf32>
    %251 = arith.addf %249, %250 : vector<4x96xf32>
    %252 = vector.extract_strided_slice %248 {offsets = [0, 0], sizes = [4, 32], strides = [1, 1]} : vector<4x96xf32> to vector<4x32xf32>
    %253 = vector.extract_strided_slice %251 {offsets = [0, 0], sizes = [4, 32], strides = [1, 1]} : vector<4x96xf32> to vector<4x32xf32>
    %254 = arith.addf %252, %253 : vector<4x32xf32>
    %255 = arith.negf %254 : vector<4x32xf32>
    %256 = math.exp %255 : vector<4x32xf32>
    %cst_62 = arith.constant 1.000000e+00 : f32
    %257 = vector.broadcast %cst_62 : f32 to vector<4x32xf32>
    %258 = arith.addf %257, %256 : vector<4x32xf32>
    %259 = arith.divf %257, %258 : vector<4x32xf32>
    %260 = vector.extract_strided_slice %248 {offsets = [0, 32], sizes = [4, 32], strides = [1, 1]} : vector<4x96xf32> to vector<4x32xf32>
    %261 = vector.extract_strided_slice %251 {offsets = [0, 32], sizes = [4, 32], strides = [1, 1]} : vector<4x96xf32> to vector<4x32xf32>
    %262 = arith.addf %260, %261 : vector<4x32xf32>
    %263 = arith.negf %262 : vector<4x32xf32>
    %264 = math.exp %263 : vector<4x32xf32>
    %cst_63 = arith.constant 1.000000e+00 : f32
    %265 = vector.broadcast %cst_63 : f32 to vector<4x32xf32>
    %266 = arith.addf %265, %264 : vector<4x32xf32>
    %267 = arith.divf %265, %266 : vector<4x32xf32>
    %268 = vector.extract_strided_slice %248 {offsets = [0, 64], sizes = [4, 32], strides = [1, 1]} : vector<4x96xf32> to vector<4x32xf32>
    %269 = vector.extract_strided_slice %251 {offsets = [0, 64], sizes = [4, 32], strides = [1, 1]} : vector<4x96xf32> to vector<4x32xf32>
    %270 = arith.mulf %259, %269 : vector<4x32xf32>
    %271 = arith.addf %268, %270 : vector<4x32xf32>
    %272 = math.tanh %271 : vector<4x32xf32>
    %cst_64 = arith.constant 1.000000e+00 : f32
    %273 = vector.broadcast %cst_64 : f32 to vector<4x32xf32>
    %274 = arith.subf %273, %267 : vector<4x32xf32>
    %275 = arith.mulf %274, %272 : vector<4x32xf32>
    %276 = arith.mulf %267, %209 : vector<4x32xf32>
    %277 = arith.addf %275, %276 : vector<4x32xf32>
    %278 = arith.index_cast %c3_i32 : i32 to index
    %c0_65 = arith.constant 0 : index
    %c0_66 = arith.constant 0 : index
    %279 = vector.load %arg9[%278, %c0_65, %c0_66] : memref<8x4x32xf32, #tpu.memory_space<vmem>>, vector<1x4x32xf32>
    %280 = vector.shape_cast %279 : vector<1x4x32xf32> to vector<4x32xf32>
    %281 = vector.shape_cast %277 : vector<4x32xf32> to vector<1x4x32xf32>
    tpu.vector_store %arg9[%278, %c0_65, %c0_66], %281 {strides = array<i32>} : memref<8x4x32xf32, #tpu.memory_space<vmem>>, vector<1x4x32xf32>,
    %c4_i32 = arith.constant 4 : i32
    %282 = arith.index_cast %c4_i32 : i32 to index
    %c0_67 = arith.constant 0 : index
    %c0_68 = arith.constant 0 : index
    %283 = vector.load %arg1[%282, %c0_67, %c0_68] : memref<8x4x96xf32, #tpu.memory_space<vmem>>, vector<1x4x96xf32>
    %284 = vector.shape_cast %283 : vector<1x4x96xf32> to vector<4x96xf32>
    %cst_69 = arith.constant dense<0.000000e+00> : vector<4x96xf32>
    %285 = tpu.matmul %245, %0, %cst_69 {dimension_numbers = #tpu.dot_dimension_numbers<[1], [0], [0], [1], [0, 0, 1, 1], [], []>} : vector<4x32xf32>, vector<32x96xf32>, vector<4x96xf32> -> vector<4x96xf32>
    %286 = vector.broadcast %1 : vector<1x96xf32> to vector<4x96xf32>
    %287 = arith.addf %285, %286 : vector<4x96xf32>
    %288 = vector.extract_strided_slice %284 {offsets = [0, 0], sizes = [4, 32], strides = [1, 1]} : vector<4x96xf32> to vector<4x32xf32>
    %289 = vector.extract_strided_slice %287 {offsets = [0, 0], sizes = [4, 32], strides = [1, 1]} : vector<4x96xf32> to vector<4x32xf32>
    %290 = arith.addf %288, %289 : vector<4x32xf32>
    %291 = arith.negf %290 : vector<4x32xf32>
    %292 = math.exp %291 : vector<4x32xf32>
    %cst_70 = arith.constant 1.000000e+00 : f32
    %293 = vector.broadcast %cst_70 : f32 to vector<4x32xf32>
    %294 = arith.addf %293, %292 : vector<4x32xf32>
    %295 = arith.divf %293, %294 : vector<4x32xf32>
    %296 = vector.extract_strided_slice %284 {offsets = [0, 32], sizes = [4, 32], strides = [1, 1]} : vector<4x96xf32> to vector<4x32xf32>
    %297 = vector.extract_strided_slice %287 {offsets = [0, 32], sizes = [4, 32], strides = [1, 1]} : vector<4x96xf32> to vector<4x32xf32>
    %298 = arith.addf %296, %297 : vector<4x32xf32>
    %299 = arith.negf %298 : vector<4x32xf32>
    %300 = math.exp %299 : vector<4x32xf32>
    %cst_71 = arith.constant 1.000000e+00 : f32
    %301 = vector.broadcast %cst_71 : f32 to vector<4x32xf32>
    %302 = arith.addf %301, %300 : vector<4x32xf32>
    %303 = arith.divf %301, %302 : vector<4x32xf32>
    %304 = vector.extract_strided_slice %284 {offsets = [0, 64], sizes = [4, 32], strides = [1, 1]} : vector<4x96xf32> to vector<4x32xf32>
    %305 = vector.extract_strided_slice %287 {offsets = [0, 64], sizes = [4, 32], strides = [1, 1]} : vector<4x96xf32> to vector<4x32xf32>
    %306 = arith.mulf %295, %305 : vector<4x32xf32>
    %307 = arith.addf %304, %306 : vector<4x32xf32>
    %308 = math.tanh %307 : vector<4x32xf32>
    %cst_72 = arith.constant 1.000000e+00 : f32
    %309 = vector.broadcast %cst_72 : f32 to vector<4x32xf32>
    %310 = arith.subf %309, %303 : vector<4x32xf32>
    %311 = arith.mulf %310, %308 : vector<4x32xf32>
    %312 = arith.mulf %303, %245 : vector<4x32xf32>
    %313 = arith.addf %311, %312 : vector<4x32xf32>
    %cst_73 = arith.constant dense<0.000000e+00> : vector<4x96xf32>
    %314 = tpu.matmul %313, %2, %cst_73 {dimension_numbers = #tpu.dot_dimension_numbers<[1], [0], [0], [1], [0, 0, 1, 1], [], []>} : vector<4x32xf32>, vector<32x96xf32>, vector<4x96xf32> -> vector<4x96xf32>
    %315 = vector.broadcast %3 : vector<1x96xf32> to vector<4x96xf32>
    %316 = arith.addf %314, %315 : vector<4x96xf32>
    %cst_74 = arith.constant dense<0.000000e+00> : vector<4x96xf32>
    %317 = tpu.matmul %277, %4, %cst_74 {dimension_numbers = #tpu.dot_dimension_numbers<[1], [0], [0], [1], [0, 0, 1, 1], [], []>} : vector<4x32xf32>, vector<32x96xf32>, vector<4x96xf32> -> vector<4x96xf32>
    %318 = vector.broadcast %5 : vector<1x96xf32> to vector<4x96xf32>
    %319 = arith.addf %317, %318 : vector<4x96xf32>
    %320 = vector.extract_strided_slice %316 {offsets = [0, 0], sizes = [4, 32], strides = [1, 1]} : vector<4x96xf32> to vector<4x32xf32>
    %321 = vector.extract_strided_slice %319 {offsets = [0, 0], sizes = [4, 32], strides = [1, 1]} : vector<4x96xf32> to vector<4x32xf32>
    %322 = arith.addf %320, %321 : vector<4x32xf32>
    %323 = arith.negf %322 : vector<4x32xf32>
    %324 = math.exp %323 : vector<4x32xf32>
    %cst_75 = arith.constant 1.000000e+00 : f32
    %325 = vector.broadcast %cst_75 : f32 to vector<4x32xf32>
    %326 = arith.addf %325, %324 : vector<4x32xf32>
    %327 = arith.divf %325, %326 : vector<4x32xf32>
    %328 = vector.extract_strided_slice %316 {offsets = [0, 32], sizes = [4, 32], strides = [1, 1]} : vector<4x96xf32> to vector<4x32xf32>
    %329 = vector.extract_strided_slice %319 {offsets = [0, 32], sizes = [4, 32], strides = [1, 1]} : vector<4x96xf32> to vector<4x32xf32>
    %330 = arith.addf %328, %329 : vector<4x32xf32>
    %331 = arith.negf %330 : vector<4x32xf32>
    %332 = math.exp %331 : vector<4x32xf32>
    %cst_76 = arith.constant 1.000000e+00 : f32
    %333 = vector.broadcast %cst_76 : f32 to vector<4x32xf32>
    %334 = arith.addf %333, %332 : vector<4x32xf32>
    %335 = arith.divf %333, %334 : vector<4x32xf32>
    %336 = vector.extract_strided_slice %316 {offsets = [0, 64], sizes = [4, 32], strides = [1, 1]} : vector<4x96xf32> to vector<4x32xf32>
    %337 = vector.extract_strided_slice %319 {offsets = [0, 64], sizes = [4, 32], strides = [1, 1]} : vector<4x96xf32> to vector<4x32xf32>
    %338 = arith.mulf %327, %337 : vector<4x32xf32>
    %339 = arith.addf %336, %338 : vector<4x32xf32>
    %340 = math.tanh %339 : vector<4x32xf32>
    %cst_77 = arith.constant 1.000000e+00 : f32
    %341 = vector.broadcast %cst_77 : f32 to vector<4x32xf32>
    %342 = arith.subf %341, %335 : vector<4x32xf32>
    %343 = arith.mulf %342, %340 : vector<4x32xf32>
    %344 = arith.mulf %335, %277 : vector<4x32xf32>
    %345 = arith.addf %343, %344 : vector<4x32xf32>
    %346 = arith.index_cast %c4_i32 : i32 to index
    %c0_78 = arith.constant 0 : index
    %c0_79 = arith.constant 0 : index
    %347 = vector.load %arg9[%346, %c0_78, %c0_79] : memref<8x4x32xf32, #tpu.memory_space<vmem>>, vector<1x4x32xf32>
    %348 = vector.shape_cast %347 : vector<1x4x32xf32> to vector<4x32xf32>
    %349 = vector.shape_cast %345 : vector<4x32xf32> to vector<1x4x32xf32>
    tpu.vector_store %arg9[%346, %c0_78, %c0_79], %349 {strides = array<i32>} : memref<8x4x32xf32, #tpu.memory_space<vmem>>, vector<1x4x32xf32>,
    %c5_i32 = arith.constant 5 : i32
    %350 = arith.index_cast %c5_i32 : i32 to index
    %c0_80 = arith.constant 0 : index
    %c0_81 = arith.constant 0 : index
    %351 = vector.load %arg1[%350, %c0_80, %c0_81] : memref<8x4x96xf32, #tpu.memory_space<vmem>>, vector<1x4x96xf32>
    %352 = vector.shape_cast %351 : vector<1x4x96xf32> to vector<4x96xf32>
    %cst_82 = arith.constant dense<0.000000e+00> : vector<4x96xf32>
    %353 = tpu.matmul %313, %0, %cst_82 {dimension_numbers = #tpu.dot_dimension_numbers<[1], [0], [0], [1], [0, 0, 1, 1], [], []>} : vector<4x32xf32>, vector<32x96xf32>, vector<4x96xf32> -> vector<4x96xf32>
    %354 = vector.broadcast %1 : vector<1x96xf32> to vector<4x96xf32>
    %355 = arith.addf %353, %354 : vector<4x96xf32>
    %356 = vector.extract_strided_slice %352 {offsets = [0, 0], sizes = [4, 32], strides = [1, 1]} : vector<4x96xf32> to vector<4x32xf32>
    %357 = vector.extract_strided_slice %355 {offsets = [0, 0], sizes = [4, 32], strides = [1, 1]} : vector<4x96xf32> to vector<4x32xf32>
    %358 = arith.addf %356, %357 : vector<4x32xf32>
    %359 = arith.negf %358 : vector<4x32xf32>
    %360 = math.exp %359 : vector<4x32xf32>
    %cst_83 = arith.constant 1.000000e+00 : f32
    %361 = vector.broadcast %cst_83 : f32 to vector<4x32xf32>
    %362 = arith.addf %361, %360 : vector<4x32xf32>
    %363 = arith.divf %361, %362 : vector<4x32xf32>
    %364 = vector.extract_strided_slice %352 {offsets = [0, 32], sizes = [4, 32], strides = [1, 1]} : vector<4x96xf32> to vector<4x32xf32>
    %365 = vector.extract_strided_slice %355 {offsets = [0, 32], sizes = [4, 32], strides = [1, 1]} : vector<4x96xf32> to vector<4x32xf32>
    %366 = arith.addf %364, %365 : vector<4x32xf32>
    %367 = arith.negf %366 : vector<4x32xf32>
    %368 = math.exp %367 : vector<4x32xf32>
    %cst_84 = arith.constant 1.000000e+00 : f32
    %369 = vector.broadcast %cst_84 : f32 to vector<4x32xf32>
    %370 = arith.addf %369, %368 : vector<4x32xf32>
    %371 = arith.divf %369, %370 : vector<4x32xf32>
    %372 = vector.extract_strided_slice %352 {offsets = [0, 64], sizes = [4, 32], strides = [1, 1]} : vector<4x96xf32> to vector<4x32xf32>
    %373 = vector.extract_strided_slice %355 {offsets = [0, 64], sizes = [4, 32], strides = [1, 1]} : vector<4x96xf32> to vector<4x32xf32>
    %374 = arith.mulf %363, %373 : vector<4x32xf32>
    %375 = arith.addf %372, %374 : vector<4x32xf32>
    %376 = math.tanh %375 : vector<4x32xf32>
    %cst_85 = arith.constant 1.000000e+00 : f32
    %377 = vector.broadcast %cst_85 : f32 to vector<4x32xf32>
    %378 = arith.subf %377, %371 : vector<4x32xf32>
    %379 = arith.mulf %378, %376 : vector<4x32xf32>
    %380 = arith.mulf %371, %313 : vector<4x32xf32>
    %381 = arith.addf %379, %380 : vector<4x32xf32>
    %cst_86 = arith.constant dense<0.000000e+00> : vector<4x96xf32>
    %382 = tpu.matmul %381, %2, %cst_86 {dimension_numbers = #tpu.dot_dimension_numbers<[1], [0], [0], [1], [0, 0, 1, 1], [], []>} : vector<4x32xf32>, vector<32x96xf32>, vector<4x96xf32> -> vector<4x96xf32>
    %383 = vector.broadcast %3 : vector<1x96xf32> to vector<4x96xf32>
    %384 = arith.addf %382, %383 : vector<4x96xf32>
    %cst_87 = arith.constant dense<0.000000e+00> : vector<4x96xf32>
    %385 = tpu.matmul %345, %4, %cst_87 {dimension_numbers = #tpu.dot_dimension_numbers<[1], [0], [0], [1], [0, 0, 1, 1], [], []>} : vector<4x32xf32>, vector<32x96xf32>, vector<4x96xf32> -> vector<4x96xf32>
    %386 = vector.broadcast %5 : vector<1x96xf32> to vector<4x96xf32>
    %387 = arith.addf %385, %386 : vector<4x96xf32>
    %388 = vector.extract_strided_slice %384 {offsets = [0, 0], sizes = [4, 32], strides = [1, 1]} : vector<4x96xf32> to vector<4x32xf32>
    %389 = vector.extract_strided_slice %387 {offsets = [0, 0], sizes = [4, 32], strides = [1, 1]} : vector<4x96xf32> to vector<4x32xf32>
    %390 = arith.addf %388, %389 : vector<4x32xf32>
    %391 = arith.negf %390 : vector<4x32xf32>
    %392 = math.exp %391 : vector<4x32xf32>
    %cst_88 = arith.constant 1.000000e+00 : f32
    %393 = vector.broadcast %cst_88 : f32 to vector<4x32xf32>
    %394 = arith.addf %393, %392 : vector<4x32xf32>
    %395 = arith.divf %393, %394 : vector<4x32xf32>
    %396 = vector.extract_strided_slice %384 {offsets = [0, 32], sizes = [4, 32], strides = [1, 1]} : vector<4x96xf32> to vector<4x32xf32>
    %397 = vector.extract_strided_slice %387 {offsets = [0, 32], sizes = [4, 32], strides = [1, 1]} : vector<4x96xf32> to vector<4x32xf32>
    %398 = arith.addf %396, %397 : vector<4x32xf32>
    %399 = arith.negf %398 : vector<4x32xf32>
    %400 = math.exp %399 : vector<4x32xf32>
    %cst_89 = arith.constant 1.000000e+00 : f32
    %401 = vector.broadcast %cst_89 : f32 to vector<4x32xf32>
    %402 = arith.addf %401, %400 : vector<4x32xf32>
    %403 = arith.divf %401, %402 : vector<4x32xf32>
    %404 = vector.extract_strided_slice %384 {offsets = [0, 64], sizes = [4, 32], strides = [1, 1]} : vector<4x96xf32> to vector<4x32xf32>
    %405 = vector.extract_strided_slice %387 {offsets = [0, 64], sizes = [4, 32], strides = [1, 1]} : vector<4x96xf32> to vector<4x32xf32>
    %406 = arith.mulf %395, %405 : vector<4x32xf32>
    %407 = arith.addf %404, %406 : vector<4x32xf32>
    %408 = math.tanh %407 : vector<4x32xf32>
    %cst_90 = arith.constant 1.000000e+00 : f32
    %409 = vector.broadcast %cst_90 : f32 to vector<4x32xf32>
    %410 = arith.subf %409, %403 : vector<4x32xf32>
    %411 = arith.mulf %410, %408 : vector<4x32xf32>
    %412 = arith.mulf %403, %345 : vector<4x32xf32>
    %413 = arith.addf %411, %412 : vector<4x32xf32>
    %414 = arith.index_cast %c5_i32 : i32 to index
    %c0_91 = arith.constant 0 : index
    %c0_92 = arith.constant 0 : index
    %415 = vector.load %arg9[%414, %c0_91, %c0_92] : memref<8x4x32xf32, #tpu.memory_space<vmem>>, vector<1x4x32xf32>
    %416 = vector.shape_cast %415 : vector<1x4x32xf32> to vector<4x32xf32>
    %417 = vector.shape_cast %413 : vector<4x32xf32> to vector<1x4x32xf32>
    tpu.vector_store %arg9[%414, %c0_91, %c0_92], %417 {strides = array<i32>} : memref<8x4x32xf32, #tpu.memory_space<vmem>>, vector<1x4x32xf32>,
    %c6_i32 = arith.constant 6 : i32
    %418 = arith.index_cast %c6_i32 : i32 to index
    %c0_93 = arith.constant 0 : index
    %c0_94 = arith.constant 0 : index
    %419 = vector.load %arg1[%418, %c0_93, %c0_94] : memref<8x4x96xf32, #tpu.memory_space<vmem>>, vector<1x4x96xf32>
    %420 = vector.shape_cast %419 : vector<1x4x96xf32> to vector<4x96xf32>
    %cst_95 = arith.constant dense<0.000000e+00> : vector<4x96xf32>
    %421 = tpu.matmul %381, %0, %cst_95 {dimension_numbers = #tpu.dot_dimension_numbers<[1], [0], [0], [1], [0, 0, 1, 1], [], []>} : vector<4x32xf32>, vector<32x96xf32>, vector<4x96xf32> -> vector<4x96xf32>
    %422 = vector.broadcast %1 : vector<1x96xf32> to vector<4x96xf32>
    %423 = arith.addf %421, %422 : vector<4x96xf32>
    %424 = vector.extract_strided_slice %420 {offsets = [0, 0], sizes = [4, 32], strides = [1, 1]} : vector<4x96xf32> to vector<4x32xf32>
    %425 = vector.extract_strided_slice %423 {offsets = [0, 0], sizes = [4, 32], strides = [1, 1]} : vector<4x96xf32> to vector<4x32xf32>
    %426 = arith.addf %424, %425 : vector<4x32xf32>
    %427 = arith.negf %426 : vector<4x32xf32>
    %428 = math.exp %427 : vector<4x32xf32>
    %cst_96 = arith.constant 1.000000e+00 : f32
    %429 = vector.broadcast %cst_96 : f32 to vector<4x32xf32>
    %430 = arith.addf %429, %428 : vector<4x32xf32>
    %431 = arith.divf %429, %430 : vector<4x32xf32>
    %432 = vector.extract_strided_slice %420 {offsets = [0, 32], sizes = [4, 32], strides = [1, 1]} : vector<4x96xf32> to vector<4x32xf32>
    %433 = vector.extract_strided_slice %423 {offsets = [0, 32], sizes = [4, 32], strides = [1, 1]} : vector<4x96xf32> to vector<4x32xf32>
    %434 = arith.addf %432, %433 : vector<4x32xf32>
    %435 = arith.negf %434 : vector<4x32xf32>
    %436 = math.exp %435 : vector<4x32xf32>
    %cst_97 = arith.constant 1.000000e+00 : f32
    %437 = vector.broadcast %cst_97 : f32 to vector<4x32xf32>
    %438 = arith.addf %437, %436 : vector<4x32xf32>
    %439 = arith.divf %437, %438 : vector<4x32xf32>
    %440 = vector.extract_strided_slice %420 {offsets = [0, 64], sizes = [4, 32], strides = [1, 1]} : vector<4x96xf32> to vector<4x32xf32>
    %441 = vector.extract_strided_slice %423 {offsets = [0, 64], sizes = [4, 32], strides = [1, 1]} : vector<4x96xf32> to vector<4x32xf32>
    %442 = arith.mulf %431, %441 : vector<4x32xf32>
    %443 = arith.addf %440, %442 : vector<4x32xf32>
    %444 = math.tanh %443 : vector<4x32xf32>
    %cst_98 = arith.constant 1.000000e+00 : f32
    %445 = vector.broadcast %cst_98 : f32 to vector<4x32xf32>
    %446 = arith.subf %445, %439 : vector<4x32xf32>
    %447 = arith.mulf %446, %444 : vector<4x32xf32>
    %448 = arith.mulf %439, %381 : vector<4x32xf32>
    %449 = arith.addf %447, %448 : vector<4x32xf32>
    %cst_99 = arith.constant dense<0.000000e+00> : vector<4x96xf32>
    %450 = tpu.matmul %449, %2, %cst_99 {dimension_numbers = #tpu.dot_dimension_numbers<[1], [0], [0], [1], [0, 0, 1, 1], [], []>} : vector<4x32xf32>, vector<32x96xf32>, vector<4x96xf32> -> vector<4x96xf32>
    %451 = vector.broadcast %3 : vector<1x96xf32> to vector<4x96xf32>
    %452 = arith.addf %450, %451 : vector<4x96xf32>
    %cst_100 = arith.constant dense<0.000000e+00> : vector<4x96xf32>
    %453 = tpu.matmul %413, %4, %cst_100 {dimension_numbers = #tpu.dot_dimension_numbers<[1], [0], [0], [1], [0, 0, 1, 1], [], []>} : vector<4x32xf32>, vector<32x96xf32>, vector<4x96xf32> -> vector<4x96xf32>
    %454 = vector.broadcast %5 : vector<1x96xf32> to vector<4x96xf32>
    %455 = arith.addf %453, %454 : vector<4x96xf32>
    %456 = vector.extract_strided_slice %452 {offsets = [0, 0], sizes = [4, 32], strides = [1, 1]} : vector<4x96xf32> to vector<4x32xf32>
    %457 = vector.extract_strided_slice %455 {offsets = [0, 0], sizes = [4, 32], strides = [1, 1]} : vector<4x96xf32> to vector<4x32xf32>
    %458 = arith.addf %456, %457 : vector<4x32xf32>
    %459 = arith.negf %458 : vector<4x32xf32>
    %460 = math.exp %459 : vector<4x32xf32>
    %cst_101 = arith.constant 1.000000e+00 : f32
    %461 = vector.broadcast %cst_101 : f32 to vector<4x32xf32>
    %462 = arith.addf %461, %460 : vector<4x32xf32>
    %463 = arith.divf %461, %462 : vector<4x32xf32>
    %464 = vector.extract_strided_slice %452 {offsets = [0, 32], sizes = [4, 32], strides = [1, 1]} : vector<4x96xf32> to vector<4x32xf32>
    %465 = vector.extract_strided_slice %455 {offsets = [0, 32], sizes = [4, 32], strides = [1, 1]} : vector<4x96xf32> to vector<4x32xf32>
    %466 = arith.addf %464, %465 : vector<4x32xf32>
    %467 = arith.negf %466 : vector<4x32xf32>
    %468 = math.exp %467 : vector<4x32xf32>
    %cst_102 = arith.constant 1.000000e+00 : f32
    %469 = vector.broadcast %cst_102 : f32 to vector<4x32xf32>
    %470 = arith.addf %469, %468 : vector<4x32xf32>
    %471 = arith.divf %469, %470 : vector<4x32xf32>
    %472 = vector.extract_strided_slice %452 {offsets = [0, 64], sizes = [4, 32], strides = [1, 1]} : vector<4x96xf32> to vector<4x32xf32>
    %473 = vector.extract_strided_slice %455 {offsets = [0, 64], sizes = [4, 32], strides = [1, 1]} : vector<4x96xf32> to vector<4x32xf32>
    %474 = arith.mulf %463, %473 : vector<4x32xf32>
    %475 = arith.addf %472, %474 : vector<4x32xf32>
    %476 = math.tanh %475 : vector<4x32xf32>
    %cst_103 = arith.constant 1.000000e+00 : f32
    %477 = vector.broadcast %cst_103 : f32 to vector<4x32xf32>
    %478 = arith.subf %477, %471 : vector<4x32xf32>
    %479 = arith.mulf %478, %476 : vector<4x32xf32>
    %480 = arith.mulf %471, %413 : vector<4x32xf32>
    %481 = arith.addf %479, %480 : vector<4x32xf32>
    %482 = arith.index_cast %c6_i32 : i32 to index
    %c0_104 = arith.constant 0 : index
    %c0_105 = arith.constant 0 : index
    %483 = vector.load %arg9[%482, %c0_104, %c0_105] : memref<8x4x32xf32, #tpu.memory_space<vmem>>, vector<1x4x32xf32>
    %484 = vector.shape_cast %483 : vector<1x4x32xf32> to vector<4x32xf32>
    %485 = vector.shape_cast %481 : vector<4x32xf32> to vector<1x4x32xf32>
    tpu.vector_store %arg9[%482, %c0_104, %c0_105], %485 {strides = array<i32>} : memref<8x4x32xf32, #tpu.memory_space<vmem>>, vector<1x4x32xf32>,
    %c7_i32 = arith.constant 7 : i32
    %486 = arith.index_cast %c7_i32 : i32 to index
    %c0_106 = arith.constant 0 : index
    %c0_107 = arith.constant 0 : index
    %487 = vector.load %arg1[%486, %c0_106, %c0_107] : memref<8x4x96xf32, #tpu.memory_space<vmem>>, vector<1x4x96xf32>
    %488 = vector.shape_cast %487 : vector<1x4x96xf32> to vector<4x96xf32>
    %cst_108 = arith.constant dense<0.000000e+00> : vector<4x96xf32>
    %489 = tpu.matmul %449, %0, %cst_108 {dimension_numbers = #tpu.dot_dimension_numbers<[1], [0], [0], [1], [0, 0, 1, 1], [], []>} : vector<4x32xf32>, vector<32x96xf32>, vector<4x96xf32> -> vector<4x96xf32>
    %490 = vector.broadcast %1 : vector<1x96xf32> to vector<4x96xf32>
    %491 = arith.addf %489, %490 : vector<4x96xf32>
    %492 = vector.extract_strided_slice %488 {offsets = [0, 0], sizes = [4, 32], strides = [1, 1]} : vector<4x96xf32> to vector<4x32xf32>
    %493 = vector.extract_strided_slice %491 {offsets = [0, 0], sizes = [4, 32], strides = [1, 1]} : vector<4x96xf32> to vector<4x32xf32>
    %494 = arith.addf %492, %493 : vector<4x32xf32>
    %495 = arith.negf %494 : vector<4x32xf32>
    %496 = math.exp %495 : vector<4x32xf32>
    %cst_109 = arith.constant 1.000000e+00 : f32
    %497 = vector.broadcast %cst_109 : f32 to vector<4x32xf32>
    %498 = arith.addf %497, %496 : vector<4x32xf32>
    %499 = arith.divf %497, %498 : vector<4x32xf32>
    %500 = vector.extract_strided_slice %488 {offsets = [0, 32], sizes = [4, 32], strides = [1, 1]} : vector<4x96xf32> to vector<4x32xf32>
    %501 = vector.extract_strided_slice %491 {offsets = [0, 32], sizes = [4, 32], strides = [1, 1]} : vector<4x96xf32> to vector<4x32xf32>
    %502 = arith.addf %500, %501 : vector<4x32xf32>
    %503 = arith.negf %502 : vector<4x32xf32>
    %504 = math.exp %503 : vector<4x32xf32>
    %cst_110 = arith.constant 1.000000e+00 : f32
    %505 = vector.broadcast %cst_110 : f32 to vector<4x32xf32>
    %506 = arith.addf %505, %504 : vector<4x32xf32>
    %507 = arith.divf %505, %506 : vector<4x32xf32>
    %508 = vector.extract_strided_slice %488 {offsets = [0, 64], sizes = [4, 32], strides = [1, 1]} : vector<4x96xf32> to vector<4x32xf32>
    %509 = vector.extract_strided_slice %491 {offsets = [0, 64], sizes = [4, 32], strides = [1, 1]} : vector<4x96xf32> to vector<4x32xf32>
    %510 = arith.mulf %499, %509 : vector<4x32xf32>
    %511 = arith.addf %508, %510 : vector<4x32xf32>
    %512 = math.tanh %511 : vector<4x32xf32>
    %cst_111 = arith.constant 1.000000e+00 : f32
    %513 = vector.broadcast %cst_111 : f32 to vector<4x32xf32>
    %514 = arith.subf %513, %507 : vector<4x32xf32>
    %515 = arith.mulf %514, %512 : vector<4x32xf32>
    %516 = arith.mulf %507, %449 : vector<4x32xf32>
    %517 = arith.addf %515, %516 : vector<4x32xf32>
    %cst_112 = arith.constant dense<0.000000e+00> : vector<4x96xf32>
    %518 = tpu.matmul %517, %2, %cst_112 {dimension_numbers = #tpu.dot_dimension_numbers<[1], [0], [0], [1], [0, 0, 1, 1], [], []>} : vector<4x32xf32>, vector<32x96xf32>, vector<4x96xf32> -> vector<4x96xf32>
    %519 = vector.broadcast %3 : vector<1x96xf32> to vector<4x96xf32>
    %520 = arith.addf %518, %519 : vector<4x96xf32>
    %cst_113 = arith.constant dense<0.000000e+00> : vector<4x96xf32>
    %521 = tpu.matmul %481, %4, %cst_113 {dimension_numbers = #tpu.dot_dimension_numbers<[1], [0], [0], [1], [0, 0, 1, 1], [], []>} : vector<4x32xf32>, vector<32x96xf32>, vector<4x96xf32> -> vector<4x96xf32>
    %522 = vector.broadcast %5 : vector<1x96xf32> to vector<4x96xf32>
    %523 = arith.addf %521, %522 : vector<4x96xf32>
    %524 = vector.extract_strided_slice %520 {offsets = [0, 0], sizes = [4, 32], strides = [1, 1]} : vector<4x96xf32> to vector<4x32xf32>
    %525 = vector.extract_strided_slice %523 {offsets = [0, 0], sizes = [4, 32], strides = [1, 1]} : vector<4x96xf32> to vector<4x32xf32>
    %526 = arith.addf %524, %525 : vector<4x32xf32>
    %527 = arith.negf %526 : vector<4x32xf32>
    %528 = math.exp %527 : vector<4x32xf32>
    %cst_114 = arith.constant 1.000000e+00 : f32
    %529 = vector.broadcast %cst_114 : f32 to vector<4x32xf32>
    %530 = arith.addf %529, %528 : vector<4x32xf32>
    %531 = arith.divf %529, %530 : vector<4x32xf32>
    %532 = vector.extract_strided_slice %520 {offsets = [0, 32], sizes = [4, 32], strides = [1, 1]} : vector<4x96xf32> to vector<4x32xf32>
    %533 = vector.extract_strided_slice %523 {offsets = [0, 32], sizes = [4, 32], strides = [1, 1]} : vector<4x96xf32> to vector<4x32xf32>
    %534 = arith.addf %532, %533 : vector<4x32xf32>
    %535 = arith.negf %534 : vector<4x32xf32>
    %536 = math.exp %535 : vector<4x32xf32>
    %cst_115 = arith.constant 1.000000e+00 : f32
    %537 = vector.broadcast %cst_115 : f32 to vector<4x32xf32>
    %538 = arith.addf %537, %536 : vector<4x32xf32>
    %539 = arith.divf %537, %538 : vector<4x32xf32>
    %540 = vector.extract_strided_slice %520 {offsets = [0, 64], sizes = [4, 32], strides = [1, 1]} : vector<4x96xf32> to vector<4x32xf32>
    %541 = vector.extract_strided_slice %523 {offsets = [0, 64], sizes = [4, 32], strides = [1, 1]} : vector<4x96xf32> to vector<4x32xf32>
    %542 = arith.mulf %531, %541 : vector<4x32xf32>
    %543 = arith.addf %540, %542 : vector<4x32xf32>
    %544 = math.tanh %543 : vector<4x32xf32>
    %cst_116 = arith.constant 1.000000e+00 : f32
    %545 = vector.broadcast %cst_116 : f32 to vector<4x32xf32>
    %546 = arith.subf %545, %539 : vector<4x32xf32>
    %547 = arith.mulf %546, %544 : vector<4x32xf32>
    %548 = arith.mulf %539, %481 : vector<4x32xf32>
    %549 = arith.addf %547, %548 : vector<4x32xf32>
    %550 = arith.index_cast %c7_i32 : i32 to index
    %c0_117 = arith.constant 0 : index
    %c0_118 = arith.constant 0 : index
    %551 = vector.load %arg9[%550, %c0_117, %c0_118] : memref<8x4x32xf32, #tpu.memory_space<vmem>>, vector<1x4x32xf32>
    %552 = vector.shape_cast %551 : vector<1x4x32xf32> to vector<4x32xf32>
    %553 = vector.shape_cast %549 : vector<4x32xf32> to vector<1x4x32xf32>
    tpu.vector_store %arg9[%550, %c0_117, %c0_118], %553 {strides = array<i32>} : memref<8x4x32xf32, #tpu.memory_space<vmem>>, vector<1x4x32xf32>,
    %c8_i32 = arith.constant 8 : i32
    %c0_119 = arith.constant 0 : index
    %c0_120 = arith.constant 0 : index
    %c0_121 = arith.constant 0 : index
    %554 = vector.load %arg10[%c0_119, %c0_120, %c0_121] : memref<2x4x32xf32, #tpu.memory_space<vmem>>, vector<1x4x32xf32>
    %555 = vector.shape_cast %554 : vector<1x4x32xf32> to vector<4x32xf32>
    %556 = vector.shape_cast %517 : vector<4x32xf32> to vector<1x4x32xf32>
    tpu.vector_store %arg10[%c0_119, %c0_120, %c0_121], %556 {strides = array<i32>} : memref<2x4x32xf32, #tpu.memory_space<vmem>>, vector<1x4x32xf32>,
    %c1_122 = arith.constant 1 : index
    %c0_123 = arith.constant 0 : index
    %c0_124 = arith.constant 0 : index
    %557 = vector.load %arg10[%c1_122, %c0_123, %c0_124] : memref<2x4x32xf32, #tpu.memory_space<vmem>>, vector<1x4x32xf32>
    %558 = vector.shape_cast %557 : vector<1x4x32xf32> to vector<4x32xf32>
    %559 = vector.shape_cast %549 : vector<4x32xf32> to vector<1x4x32xf32>
    tpu.vector_store %arg10[%c1_122, %c0_123, %c0_124], %559 {strides = array<i32>} : memref<2x4x32xf32, #tpu.memory_space<vmem>>, vector<1x4x32xf32>,
    return
  }
  func.func @transform_0(%arg0: i32) -> (i32, i32, i32) {
    %c0_i32 = arith.constant 0 : i32
    %c0_i32_0 = arith.constant 0 : i32
    %c0_i32_1 = arith.constant 0 : i32
    %c0_i32_2 = arith.constant 0 : i32
    return %c0_i32, %c0_i32_0, %c0_i32_1 : i32, i32, i32
  }
  func.func @transform_1(%arg0: i32) -> (i32, i32, i32) {
    %c0_i32 = arith.constant 0 : i32
    %c0_i32_0 = arith.constant 0 : i32
    %c0_i32_1 = arith.constant 0 : i32
    %c0_i32_2 = arith.constant 0 : i32
    return %c0_i32, %c0_i32_0, %c0_i32_1 : i32, i32, i32
  }
  func.func @transform_2(%arg0: i32) -> (i32, i32) {
    %c0_i32 = arith.constant 0 : i32
    %c0_i32_0 = arith.constant 0 : i32
    %c0_i32_1 = arith.constant 0 : i32
    return %c0_i32, %c0_i32_0 : i32, i32
  }
  func.func @transform_3(%arg0: i32) -> (i32, i32) {
    %c0_i32 = arith.constant 0 : i32
    %c0_i32_0 = arith.constant 0 : i32
    %c0_i32_1 = arith.constant 0 : i32
    return %c0_i32, %c0_i32_0 : i32, i32
  }
  func.func @transform_4(%arg0: i32) -> (i32, i32) {
    %c0_i32 = arith.constant 0 : i32
    %c0_i32_0 = arith.constant 0 : i32
    %c0_i32_1 = arith.constant 0 : i32
    return %c0_i32, %c0_i32_0 : i32, i32
  }
  func.func @transform_5(%arg0: i32) -> (i32, i32) {
    %c0_i32 = arith.constant 0 : i32
    %c0_i32_0 = arith.constant 0 : i32
    %c0_i32_1 = arith.constant 0 : i32
    return %c0_i32, %c0_i32_0 : i32, i32
  }
  func.func @transform_6(%arg0: i32) -> (i32, i32) {
    %c0_i32 = arith.constant 0 : i32
    %c0_i32_0 = arith.constant 0 : i32
    %c0_i32_1 = arith.constant 0 : i32
    return %c0_i32, %c0_i32_0 : i32, i32
  }
  func.func @transform_7(%arg0: i32) -> (i32, i32) {
    %c0_i32 = arith.constant 0 : i32
    %c0_i32_0 = arith.constant 0 : i32
    %c0_i32_1 = arith.constant 0 : i32
    return %c0_i32, %c0_i32_0 : i32, i32
  }
  func.func @transform_8(%arg0: i32) -> (i32, i32, i32) {
    %c0_i32 = arith.constant 0 : i32
    %c0_i32_0 = arith.constant 0 : i32
    %c0_i32_1 = arith.constant 0 : i32
    %c0_i32_2 = arith.constant 0 : i32
    return %c0_i32, %c0_i32_0, %c0_i32_1 : i32, i32, i32
  }
  func.func @transform_9(%arg0: i32) -> (i32, i32, i32) {
    %c0_i32 = arith.constant 0 : i32
    %c0_i32_0 = arith.constant 0 : i32
    %c0_i32_1 = arith.constant 0 : i32
    %c0_i32_2 = arith.constant 0 : i32
    return %c0_i32, %c0_i32_0, %c0_i32_1 : i32, i32, i32
  }
}

</mosaic_0001>

<bundles_post_ra>
// kernel: tpu_custom_call.1
= control target key start
LH: loop header
LB: loop body
LE: loop exit
PB: predicated region body
PF: predicated region fallthrough
CT: control target
= control target key end

     0   :  { %15 = vsyncpa [#allocation3], 0  ;;  %s3678_s0 = inlined_call_operand.hbm [shape: f32[8,4,96], index: 0, kind: input, shape index: {}]   ;;  %s3679_s1 = inlined_call_operand.hbm [shape: f32[2,4,32], index: 1, kind: input, shape index: {}]   ;;  %s3680_s2 = inlined_call_operand.hbm [shape: f32[32,96], index: 2, kind: input, shape index: {}]   ;;  %s3681_s3 = inlined_call_operand.vmem [shape: f32[1,96], index: 3, kind: input, shape index: {}]   ;;  %s3682_s4 = inlined_call_operand.hbm [shape: f32[32,96], index: 4, kind: input, shape index: {}]   ;;  %s3683_s5 = inlined_call_operand.vmem [shape: f32[1,96], index: 5, kind: input, shape index: {}]   ;;  %s3684_s6 = inlined_call_operand.hbm [shape: f32[32,96], index: 6, kind: input, shape index: {}]   ;;  %s3685_s7 = inlined_call_operand.vmem [shape: f32[1,96], index: 7, kind: input, shape index: {}]   ;;  %s3686_s8 = inlined_call_operand.hbm [shape: f32[8,4,32], index: 8, kind: output, shape index: {0}]   ;;  %s3687_s9 = inlined_call_operand.hbm [shape: f32[2,4,32], index: 9, kind: output, shape index: {1}]  }
   0x1   :  { %16 = vsyncpa [#allocation6], 0 }
   0x2   :  { %17 = vsyncpa [#allocation9], 0 }
   0x3   :  { %18 = vsyncpa [#allocation4], 0 }
   0x4   :  { %19 = vsyncpa [#allocation13], 0  ;;  %s3105_s30 = smov [#allocation5]  }
   0x5   :  { %s37_s10 = sshll.u32 %s3105_s30, 4  ;;  %s38_s10 = int_to_ptr.vmem [resolvable:$true] %s37_s10 }
   0x6   :  { %s2963_s11 = scalar_lea.vmem %s38_s10, 128  ;;  %p2968_p1 = scmp.lt.s32.totalorder %s38_s10, %s38_s10 }
   0x7   :  { %p2964_p0 = scmp.ne.s32.totalorder %s38_s10, %s2963_s11  ;;  %p2969_p2 = scmp.lt.s32.totalorder %s2963_s11, %s2963_s11 }
   0x9   :  { %p2970_p3 = por %p2969_p2, %p2968_p1 }
   0xb   :  { %p2971_p4 = pnand %p2970_p3, %p2964_p0 }
   0xd   :  { %2974 = shalt.err (!%p2971_p4)
}
   0xe   :  { %s3106_s12 = smov 64   ;;  %s3107_s13 = smov 4  }
   0xf   :  { %43 = dma.hbm_to_vmem [thread:$0]  %s3679_s1, 128, %s38_s10, [#allocation6], %s3106_s12, %s3106_s12, %s3107_s13  }
  0x10   :  { %s3108_s16 = smov [#allocation8]   ;;  %s3109_s18 = smov [#allocation2]  }
  0x11   :  { %s63_s17 = sshll.u32 %s3108_s16, 4  ;;  %s25_s19 = sshll.u32 %s3109_s18, 4  ;;  %s64_s17 = int_to_ptr.vmem [resolvable:$true] %s63_s17  ;;  %s26_s19 = int_to_ptr.vmem [resolvable:$true] %s25_s19 }
  0x12   :  { %s2983_s20 = scalar_lea.vmem %s64_s17, 512  ;;  %p2988_p6 = scmp.lt.s32.totalorder %s64_s17, %s64_s17 }
  0x13   :  { %p2984_p5 = scmp.ne.s32.totalorder %s64_s17, %s2983_s20  ;;  %p2989_p7 = scmp.lt.s32.totalorder %s2983_s20, %s2983_s20 }
  0x15   :  { %p2990_p8 = por %p2989_p7, %p2988_p6 }
  0x17   :  { %p2991_p9 = pnand %p2990_p8, %p2984_p5 }
  0x19   :  { %2994 = shalt.err (!%p2991_p9)
}
  0x1a   :  { %s3110_s21 = smov 128   ;;  %s3111_s22 = smov 8  }
  0x1b   :  { %69 = dma.hbm_to_vmem [thread:$0]  %s3682_s4, 512, %s64_s17, [#allocation9], %s3110_s21, %s3110_s21, %s3111_s22  }
  0x1c   :  { %s3003_s1 = scalar_lea.vmem %s26_s19, 512  ;;  %p3008_p11 = scmp.lt.s32.totalorder %s26_s19, %s26_s19 }
  0x1d   :  { %p3004_p10 = scmp.ne.s32.totalorder %s26_s19, %s3003_s1  ;;  %p3009_p12 = scmp.lt.s32.totalorder %s3003_s1, %s3003_s1 }
  0x1f   :  { %p3010_p13 = por %p3009_p12, %p3008_p11 }
  0x21   :  { %p3011_p0 = pnand %p3010_p13, %p3004_p10 }
  0x23   :  { %3014 = shalt.err (!%p3011_p0)
}
  0x24   :  { %31 = dma.hbm_to_vmem [thread:$0]  %s3678_s0, 512, %s26_s19, [#allocation3], %s3106_s12, %s3106_s12, %s3107_s13  }
  0x25   :  { %s3112_s27 = smov [#allocation7]   ;;  %s3113_s29 = smov [#allocation10]  }
  0x26   :  { %s49_s28 = sshll.u32 %s3112_s27, 4  ;;  %s77_s4 = sshll.u32 %s3113_s29, 4  ;;  %s50_s28 = int_to_ptr.vmem [resolvable:$true] %s49_s28  ;;  %s78_s4 = int_to_ptr.vmem [resolvable:$true] %s77_s4 }
  0x27   :  { %s3023_s30 = scalar_lea.vmem %s50_s28, 512  ;;  %p3028_p2 = scmp.lt.s32.totalorder %s50_s28, %s50_s28 }
  0x28   :  { %p3024_p1 = scmp.ne.s32.totalorder %s50_s28, %s3023_s30  ;;  %p3029_p3 = scmp.lt.s32.totalorder %s3023_s30, %s3023_s30 }
  0x2a   :  { %p3030_p4 = por %p3029_p3, %p3028_p2 }
  0x2c   :  { %p3031_p5 = pnand %p3030_p4, %p3024_p1 }
  0x2e   :  { %3034 = shalt.err (!%p3031_p5)
}
  0x2f   :  { %55 = dma.hbm_to_vmem [thread:$0]  %s3680_s2, 512, %s50_s28, [#allocation6], %s3110_s21, %s3110_s21, %s3111_s22  }
  0x30   :  { %s3043_s0 = scalar_lea.vmem %s78_s4, 512  ;;  %p3048_p7 = scmp.lt.s32.totalorder %s78_s4, %s78_s4 }
  0x31   :  { %p3044_p6 = scmp.ne.s32.totalorder %s78_s4, %s3043_s0  ;;  %p3049_p8 = scmp.lt.s32.totalorder %s3043_s0, %s3043_s0 }
  0x33   :  { %p3050_p9 = por %p3049_p8, %p3048_p7 }
  0x35   :  { %p3051_p10 = pnand %p3050_p9, %p3044_p6 }
  0x37   :  { %3054 = shalt.err (!%p3051_p10)
}
  0x38   :  { %83 = dma.hbm_to_vmem [thread:$0]  %s3684_s6, 512, %s78_s4, [#allocation9], %s3110_s21, %s3110_s21, %s3111_s22  }
  0x39   :  { %3095 = dma.done.wait [#allocation3], 512  }
  0x3a   :  { %3096 = vsyncadd [#allocation3], 4294966784 }
  0x3b   :  { %3097 = dma.done.wait [#allocation6], 640  }
  0x3c   :  { %3098 = vsyncadd [#allocation6], 4294966656 }
  0x3d   :  { %3099 = dma.done.wait [#allocation9], 1024  }
  0x3e   :  { %3100 = vsyncadd [#allocation9], 4294966272  ;;  %v3114_v0 = vmov 0.0   ;;  %vm3115_vm0 = vmmov 0   ;;  %v3206_v1 = vld [vmem:[#allocation7 + $0x18] sm:$0xff]  ;;  %v3208_v2 = vld [vmem:[#allocation7 + $0x10] sm:$0xff] }
  0x3f   :  { %2565 = vmatprep.subr.mxu0 %v3114_v0  ;;  %2573 = vmatprep.mubr.msk.f32.mxu0 %vm3115_vm0, %v3114_v0  ;;  %v3212_v3 = vld [vmem:[#allocation7 + $0x8] sm:$0xff]  ;;  %v3216_v4 = vld [vmem:[#allocation7] sm:$0xff]  ;;  %v116_v5 = vld [vmem:[#allocation5] sm:$0xf]  ;;  %vm126_vm1 = vcmask 261120   ;;  %s3116_s16 = smov 96  }
  0x40   :  { %2576 = vmatprep.subr.mxu1 %v3114_v0  ;;  %2584 = vmatprep.mubr.msk.f32.mxu1 %vm3115_vm0, %v3114_v0  ;;  %v3228_v6 = vld [vmem:[%s3681_s3] ss:$0 sm:$0xff]  ;;  %v3235_v21 = vld [vmem:[#allocation10 + $0x10] sm:$0xff]  ;;  %v3241_v23 = vld [vmem:[#allocation10 + $0x8] sm:$0xff]  ;;  %s3117_s17 = smov 32   ;;  %vm422_vm2 = vcmask 257024  }
  0x41   :  { %2566 = vmatpush3.msra.mxu0 %v3206_v1  ;;  %v119_v10 = vld [vmem:[#allocation2] sm:$0xf]  ;;  %v3244_v24 = vld [vmem:[#allocation8 + $0x10] sm:$0xff]  ;;  %v3249_v26 = vld [vmem:[#allocation10] sm:$0xff]  ;;  %s3119_s26 = smov [#allocation12]  }
  0x42   :  { %2567 = vmatprep.subr.mxu0 %v3114_v0  ;;  %v3233_v20 = vld [vmem:[#allocation10 + $0x18] sm:$0xff]  ;;  %v3252_v27 = vld [vmem:[#allocation8 + $0x8] sm:$0xff]  ;;  %v3260_v29 = vld [vmem:[#allocation8] sm:$0xff]  ;;  %s2384_s27 = sshll.u32 %s3119_s26, 4  ;;  %s2385_s27 = int_to_ptr.vmem [resolvable:$true] %s2384_s27 }
  0x43   :  { %2568 = vmatpush3.msra.mxu0 %v3208_v2  ;;  %v3238_v22 = vld [vmem:[#allocation8 + $0x18] sm:$0xff] }
  0x44   :  { %2569 = vmatprep.subr.mxu0 %v3114_v0  ;;  %2577 = vmatpush3.msra.mxu1 %v3238_v22  ;;  %v3256_v28 = vld [vmem:[#allocation5 + $0x4] sm:$0xf]  ;;  %v3288_v36 = vld [vmem:[%s3685_s7] ss:$0 sm:$0xff] }
  0x45   :  { %2570 = vmatpush3.msra.mxu0 %v3212_v3  ;;  %2578 = vmatprep.subr.mxu1 %v3114_v0  ;;  %v3317_v41 = vld [vmem:[%s3683_s5] ss:$0 sm:$0xff]  ;;  %v425_v55 = vld [vmem:[#allocation2 + $0x4] sm:$0xf] }
  0x46   :  { %2571 = vmatprep.subr.mxu0 %v3114_v0  ;;  %2579 = vmatpush3.msra.mxu1 %v3244_v24 }
  0x47   :  { %2572 = vmatpush3.msra.mxu0 %v3216_v4  ;;  %2580 = vmatprep.subr.mxu1 %v3114_v0 }
  0x48   :  { %2574 = vmatmul.mubr.msk.f32.vlgmr.msra.gmra.mxu0 %vm126_vm1, %v116_v5  ;;  %2587 = vmatprep.subr.mxu0 %v3114_v0 }
  0x49   :  { %2595 = vmatprep.mubr.msk.f32.mxu0 %vm3115_vm0, %v3114_v0  ;;  %2588 = vmatpush3.msra.mxu0 %v3233_v20 }
  0x4a   :  { %2589 = vmatprep.subr.mxu0 %v3114_v0  ;;  %2581 = vmatpush3.msra.mxu1 %v3252_v27 }
  0x4b   :  { %2590 = vmatpush3.msra.mxu0 %v3235_v21  ;;  %2582 = vmatprep.subr.mxu1 %v3114_v0 }
  0x4c   :  { %2591 = vmatprep.subr.mxu0 %v3114_v0  ;;  %2583 = vmatpush3.msra.mxu1 %v3260_v29 }
  0x4d   :  { %2592 = vmatpush3.msra.mxu0 %v3241_v23  ;;  %2598 = vmatprep.subr.mxu1 %v3114_v0 }
  0x4e   :  { %2593 = vmatprep.subr.mxu0 %v3114_v0 }
  0x4f   :  { %2594 = vmatpush3.msra.mxu0 %v3249_v26 }
  0x50   :  { %2596 = vmatmul.mubr.msk.f32.vlgmr.msra.gmra.mxu0 %vm126_vm1, %v3256_v28  ;;  %2609 = vmatprep.subr.mxu0 %v3114_v0 }
  0x51   :  { %2610 = vmatpush3.msra.mxu0 %v3238_v22  ;;  %2617 = vmatprep.mubr.msk.f32.mxu0 %vm3115_vm0, %v3114_v0 }
  0x52   :  { %2611 = vmatprep.subr.mxu0 %v3114_v0 }
  0x53   :  { %2612 = vmatpush3.msra.mxu0 %v3244_v24 }
  0x54   :  { %2613 = vmatprep.subr.mxu0 %v3114_v0 }
  0x55   :  { %2614 = vmatpush3.msra.mxu0 %v3252_v27 }
  0x56   :  { %2615 = vmatprep.subr.mxu0 %v3114_v0 }
  0x57   :  { %2616 = vmatpush3.msra.mxu0 %v3260_v29 }
  0x58   :  { %2631 = vmatprep.subr.mxu0 %v3114_v0 }
 0x108   :  { %v196_v7 = vpop.f32.mrf.mxu0 }
 0x109   :  { %v197_v8 = vadd.f32 %v3228_v6, %v196_v7 }
 0x10a   :  { %v2575_v9 = vpop.f32.mrf.mxu0 }
 0x10b   :  { %208 = vrot.lane.b32.xlu0 %v197_v8, %s3106_s12  ;;  %v200_v11 = vadd.f32 %v197_v8, %v119_v10 }
 0x10d   :  { %v2404_v12 = vmul.f32 -1.442695, %v200_v11 }
 0x10f   :  { %2844 = vpow2.f32 %v2404_v12 }
 0x110   :  { %v385_v37 = vpop.f32.mrf.mxu0 }
 0x111   :  { %v386_v38 = vadd.f32 %v3288_v36, %v385_v37 }
 0x112   :  { %v2597_v39 = vpop.f32.mrf.mxu0 }
 0x11c   :  { %v2845_v13 = vpop.eup %2844 }
 0x11d   :  { %v204_v14 = vadd.f32 1.0, %v2845_v13 }
 0x11f   :  { %2846 = vrcp.f32 %v204_v14 }
 0x12c   :  { %v2847_v15 = vpop.eup %2846 }
 0x12d   :  { %v218_v31 = vsub.f32 1.0, %v2847_v15 }
 0x17d   :  { %v209_v16 = vpop.permute.xlu0 %208 }
 0x17e   :  { %v211_v17 = vmul.f32 %v2847_v15, %v209_v16 }
 0x180   :  { %213 = vrot.lane.b32.xlu0 %v211_v17, %s3106_s12 }
 0x1f2   :  { %v214_v18 = vpop.permute.xlu0 %213 }
 0x1f3   :  { %v216_v19 = vadd.f32 %v214_v18, %v119_v10 }
 0x1f5   :  { %2848 = vtanh.f32 %v216_v19 }
 0x202   :  { %v2849_v25 = vpop.eup %2848 }
 0x203   :  { %220 = vrot.lane.b32.xlu1 %v2849_v25, %s3116_s16 }
 0x207   :  { %224 = vrot.lane.b32.xlu1 %v116_v5, %s3117_s17 }
 0x275   :  { %v221_v30 = vpop.permute.xlu1 %220 }
 0x276   :  { %v223_v33 = vmul.f32 %v221_v30, %v218_v31 }
 0x279   :  { %v225_v32 = vpop.permute.xlu1 %224 }
 0x27a   :  { %v227_v34 = vmul.f32 %v2847_v15, %v225_v32 }
 0x27c   :  { %v3281_v35 = vadd.f32 %v227_v34, %v223_v33 }
 0x27e   :  { %236 = vrot.lane.b32.xlu0 %v3281_v35, %s3116_s16 }
 0x282   :  { %397 = vrot.lane.b32.xlu0 %v386_v38, %s3106_s12 }
 0x2f0   :  { %v237_v40 = vpop.permute.xlu0 %236 }
 0x2f1   :  { %2585 = vmatmul.mubr.msk.f32.vlgmr.msra.gmra.mxu1 %vm126_vm1, %v237_v40 }
 0x2f2   :  { %2599 = vmatpush3.msra.mxu1 %v3206_v1  ;;  %2606 = vmatprep.mubr.msk.f32.mxu1 %vm3115_vm0, %v3114_v0 }
 0x2f3   :  { %2600 = vmatprep.subr.mxu1 %v3114_v0 }
 0x2f4   :  { %2601 = vmatpush3.msra.mxu1 %v3208_v2  ;;  %v398_v52 = vpop.permute.xlu0 %397 }
 0x2f5   :  { %2602 = vmatprep.subr.mxu1 %v3114_v0 }
 0x2f6   :  { %2603 = vmatpush3.msra.mxu1 %v3212_v3 }
 0x2f7   :  { %2604 = vmatprep.subr.mxu1 %v3114_v0 }
 0x2f8   :  { %2605 = vmatpush3.msra.mxu1 %v3216_v4 }
 0x2f9   :  { %2607 = vmatmul.mubr.msk.f32.vlgmr.msra.gmra.mxu1 %vm126_vm1, %v237_v40  ;;  %2620 = vmatprep.subr.mxu1 %v3114_v0 }
 0x2fa   :  { %2621 = vmatpush3.msra.mxu1 %v3233_v20  ;;  %2628 = vmatprep.mubr.msk.f32.mxu1 %vm3115_vm0, %v3114_v0 }
 0x2fb   :  { %2622 = vmatprep.subr.mxu1 %v3114_v0 }
 0x2fc   :  { %2623 = vmatpush3.msra.mxu1 %v3235_v21 }
 0x2fd   :  { %2624 = vmatprep.subr.mxu1 %v3114_v0 }
 0x2fe   :  { %2625 = vmatpush3.msra.mxu1 %v3241_v23 }
 0x2ff   :  { %2626 = vmatprep.subr.mxu1 %v3114_v0 }
 0x300   :  { %2627 = vmatpush3.msra.mxu1 %v3249_v26 }
 0x301   :  { %2642 = vmatprep.subr.mxu1 %v3114_v0 }
 0x3b1   :  { %v306_v42 = vpop.f32.mrf.mxu1 }
 0x3b2   :  { %v307_v43 = vadd.f32 %v3317_v41, %v306_v42 }
 0x3b3   :  { %v2586_v44 = vpop.f32.mrf.mxu1 }
 0x3b4   :  { %v389_v45 = vadd.f32 %v386_v38, %v307_v43  ;;  %v702_v44 = vld [vmem:[#allocation2 + $0x8] sm:$0xf] }
 0x3b6   :  { %v2409_v46 = vmul.f32 -1.442695, %v389_v45 }
 0x3b8   :  { %2850 = vpow2.f32 %v2409_v46 }
 0x3b9   :  { %v492_v47 = vpop.f32.mrf.mxu1 }
 0x3ba   :  { %v493_v48 = vadd.f32 %v3228_v6, %v492_v47 }
 0x3bb   :  { %v2608_v49 = vpop.f32.mrf.mxu1 }
 0x3bc   :  { %504 = vrot.lane.b32.xlu1 %v493_v48, %s3106_s12  ;;  %v496_v56 = vadd.f32 %v493_v48, %v425_v55 }
 0x3be   :  { %v2411_v57 = vmul.f32 -1.442695, %v496_v56 }
 0x3c5   :  { %v2851_v50 = vpop.eup %2850 }
 0x3c6   :  { %v393_v51 = vadd.f32 1.0, %v2851_v50 }
 0x3c8   :  { %2852 = vrcp.f32 %v393_v51 }
 0x3c9   :  { %2854 = vpow2.f32 %v2411_v57 }
 0x3d5   :  { %v2853_v53 = vpop.eup %2852 }
 0x3d6   :  { %v400_v54 = vmul.f32 %v2853_v53, %v398_v52  ;;  %v2855_v58 = vpop.eup %2854  ;;  %v407_v16 = vsub.f32 1.0, %v2853_v53 }
 0x3d7   :  { %v500_v59 = vadd.f32 1.0, %v2855_v58 }
 0x3d8   :  { %402 = vrot.lane.b32.xlu0 %v400_v54, %s3106_s12 }
 0x3d9   :  { %2856 = vrcp.f32 %v500_v59 }
 0x3e6   :  { %v2857_v60 = vpop.eup %2856 }
 0x3e7   :  { %v514_v11 = vsub.f32 1.0, %v2857_v60  ;;  %v520_v13 = vmul.f32 %v2857_v60, %v3281_v35 }
 0x42e   :  { %v505_v61 = vpop.permute.xlu1 %504 }
 0x42f   :  { %v507_v62 = vmul.f32 %v2857_v60, %v505_v61 }
 0x431   :  { %509 = vrot.lane.b32.xlu1 %v507_v62, %s3106_s12 }
 0x44a   :  { %v403_v63 = vpop.permute.xlu0 %402 }
 0x44b   :  { %v405_v5 = vadd.f32 %v403_v63, %v307_v43 }
 0x44d   :  { %2858 = vtanh.f32 %v405_v5 }
 0x45a   :  { %v2859_v7 = vpop.eup %2858 }
 0x45b   :  { %409 = vrot.lane.b32.xlu0 %v2859_v7, %s3116_s16 }
 0x4a3   :  { %v510_v8 = vpop.permute.xlu1 %509 }
 0x4a4   :  { %v512_v9 = vadd.f32 %v510_v8, %v425_v55 }
 0x4a6   :  { %2860 = vtanh.f32 %v512_v9 }
 0x4b3   :  { %v2861_v10 = vpop.eup %2860 }
 0x4b4   :  { %516 = vrot.lane.b32.xlu1 %v2861_v10, %s3116_s16 }
 0x4b8   :  { %413 = vrot.lane.b32.xlu1 %v3256_v28, %s3117_s17 }
 0x4cd   :  { %v410_v15 = vpop.permute.xlu0 %409 }
 0x4ce   :  { %v412_v19 = vmul.f32 %v410_v15, %v407_v16 }
 0x526   :  { %v517_v12 = vpop.permute.xlu1 %516 }
 0x527   :  { %v519_v14 = vmul.f32 %v517_v12, %v514_v11 }
 0x529   :  { %v3329_v17 = vadd.f32 %v520_v13, %v519_v14 }
 0x52a   :  { %v414_v18 = vpop.permute.xlu1 %413 }
 0x52b   :  { %v416_v25 = vmul.f32 %v2853_v53, %v414_v18  ;;  %523 = vrot.lane.b32.xlu0 %v3329_v17, %s3116_s16 }
 0x52d   :  { %v3333_v30 = vadd.f32 %v416_v25, %v412_v19 }
 0x52f   :  { %419 = vrot.lane.b32.xlu1 %v3333_v30, %s3116_s16 }
 0x59d   :  { %v524_v28 = vpop.permute.xlu0 %523 }
 0x59e   :  { %2618 = vmatmul.mubr.msk.f32.vlgmr.msra.gmra.mxu0 %vm126_vm1, %v524_v28 }
 0x59f   :  { %2632 = vmatpush3.msra.mxu0 %v3206_v1  ;;  %2639 = vmatprep.mubr.msk.f32.mxu0 %vm3115_vm0, %v3114_v0 }
 0x5a0   :  { %2633 = vmatprep.subr.mxu0 %v3114_v0 }
 0x5a1   :  { %2634 = vmatpush3.msra.mxu0 %v3208_v2  ;;  %v420_v31 = vpop.permute.xlu1 %419 }
 0x5a2   :  { %423 = vst.msk [vmem:[#allocation11] sm:$0xf] %vm422_vm2, %v420_v31  ;;  %2635 = vmatprep.subr.mxu0 %v3114_v0  ;;  %2629 = vmatmul.mubr.msk.f32.vlgmr.msra.gmra.mxu1 %vm126_vm1, %v420_v31 }
 0x5a3   :  { %2636 = vmatpush3.msra.mxu0 %v3212_v3  ;;  %2643 = vmatpush3.msra.mxu1 %v3238_v22 }
 0x5a4   :  { %2637 = vmatprep.subr.mxu0 %v3114_v0  ;;  %2644 = vmatprep.subr.mxu1 %v3114_v0 }
 0x5a5   :  { %2638 = vmatpush3.msra.mxu0 %v3216_v4  ;;  %2645 = vmatpush3.msra.mxu1 %v3244_v24 }
 0x5a6   :  { %2640 = vmatmul.mubr.msk.f32.vlgmr.msra.gmra.mxu0 %vm126_vm1, %v524_v28  ;;  %2653 = vmatprep.subr.mxu0 %v3114_v0 }
 0x5a7   :  { %2654 = vmatpush3.msra.mxu0 %v3233_v20  ;;  %2646 = vmatprep.subr.mxu1 %v3114_v0 }
 0x5a8   :  { %2655 = vmatprep.subr.mxu0 %v3114_v0  ;;  %2647 = vmatpush3.msra.mxu1 %v3252_v27 }
 0x5a9   :  { %2656 = vmatpush3.msra.mxu0 %v3235_v21  ;;  %2661 = vmatprep.mubr.msk.f32.mxu0 %vm3115_vm0, %v3114_v0 }
 0x5aa   :  { %2657 = vmatprep.subr.mxu0 %v3114_v0  ;;  %2648 = vmatprep.subr.mxu1 %v3114_v0 }
 0x5ab   :  { %2658 = vmatpush3.msra.mxu0 %v3241_v23  ;;  %2649 = vmatpush3.msra.mxu1 %v3260_v29 }
 0x5ac   :  { %2659 = vmatprep.subr.mxu0 %v3114_v0  ;;  %2650 = vmatprep.mubr.msk.f32.mxu1 %vm3115_vm0, %v3114_v0 }
 0x5ad   :  { %2660 = vmatpush3.msra.mxu0 %v3249_v26  ;;  %2664 = vmatprep.subr.mxu1 %v3114_v0 }
 0x5ae   :  { %2675 = vmatprep.subr.mxu0 %v3114_v0 }
 0x65e   :  { %v593_v32 = vpop.f32.mrf.mxu0 }
 0x65f   :  { %v594_v42 = vadd.f32 %v3317_v41, %v593_v32 }
 0x660   :  { %v2619_v33 = vpop.f32.mrf.mxu0 }
 0x662   :  { %v665_v34 = vpop.f32.mrf.mxu1 }
 0x663   :  { %v666_v35 = vadd.f32 %v3288_v36, %v665_v34 }
 0x664   :  { %v2630_v37 = vpop.f32.mrf.mxu1 }
 0x665   :  { %677 = vrot.lane.b32.xlu1 %v666_v35, %s3106_s12  ;;  %v669_v43 = vadd.f32 %v666_v35, %v594_v42 }
 0x666   :  { %v769_v38 = vpop.f32.mrf.mxu0 }
 0x667   :  { %v770_v39 = vadd.f32 %v3228_v6, %v769_v38  ;;  %v2414_v45 = vmul.f32 -1.442695, %v669_v43  ;;  %v979_v38 = vld [vmem:[#allocation2 + $0xc] sm:$0xf] }
 0x668   :  { %v2641_v40 = vpop.f32.mrf.mxu0 }
 0x669   :  { %781 = vrot.lane.b32.xlu0 %v770_v39, %s3106_s12  ;;  %v773_v46 = vadd.f32 %v770_v39, %v702_v44  ;;  %2862 = vpow2.f32 %v2414_v45 }
 0x66b   :  { %v2416_v47 = vmul.f32 -1.442695, %v773_v46 }
 0x66d   :  { %2864 = vpow2.f32 %v2416_v47 }
 0x676   :  { %v2863_v48 = vpop.eup %2862 }
 0x677   :  { %v673_v49 = vadd.f32 1.0, %v2863_v48 }
 0x679   :  { %2866 = vrcp.f32 %v673_v49 }
 0x67a   :  { %v2865_v50 = vpop.eup %2864 }
 0x67b   :  { %v777_v51 = vadd.f32 1.0, %v2865_v50 }
 0x67d   :  { %2868 = vrcp.f32 %v777_v51 }
 0x686   :  { %v2867_v52 = vpop.eup %2866 }
 0x687   :  { %v687_v5 = vsub.f32 1.0, %v2867_v52  ;;  %v693_v8 = vmul.f32 %v2867_v52, %v3333_v30 }
 0x68a   :  { %v2869_v55 = vpop.eup %2868 }
 0x68b   :  { %v791_v11 = vsub.f32 1.0, %v2869_v55  ;;  %v797_v13 = vmul.f32 %v2869_v55, %v3329_v17 }
 0x6d7   :  { %v678_v53 = vpop.permute.xlu1 %677 }
 0x6d8   :  { %v680_v54 = vmul.f32 %v2867_v52, %v678_v53 }
 0x6da   :  { %682 = vrot.lane.b32.xlu1 %v680_v54, %s3106_s12 }
 0x6db   :  { %v782_v56 = vpop.permute.xlu0 %781 }
 0x6dc   :  { %v784_v57 = vmul.f32 %v2869_v55, %v782_v56 }
 0x6de   :  { %786 = vrot.lane.b32.xlu0 %v784_v57, %s3106_s12 }
 0x74c   :  { %v683_v58 = vpop.permute.xlu1 %682 }
 0x74d   :  { %v685_v59 = vadd.f32 %v683_v58, %v594_v42 }
 0x74f   :  { %2870 = vtanh.f32 %v685_v59 }
 0x750   :  { %v787_v60 = vpop.permute.xlu0 %786 }
 0x751   :  { %v789_v61 = vadd.f32 %v787_v60, %v702_v44 }
 0x753   :  { %2872 = vtanh.f32 %v789_v61 }
 0x75c   :  { %v2871_v62 = vpop.eup %2870 }
 0x75d   :  { %689 = vrot.lane.b32.xlu1 %v2871_v62, %s3116_s16 }
 0x760   :  { %v2873_v63 = vpop.eup %2872 }
 0x761   :  { %793 = vrot.lane.b32.xlu0 %v2873_v63, %s3116_s16 }
 0x7cf   :  { %v690_v7 = vpop.permute.xlu1 %689 }
 0x7d0   :  { %v692_v9 = vmul.f32 %v690_v7, %v687_v5 }
 0x7d2   :  { %v3381_v10 = vadd.f32 %v693_v8, %v692_v9 }
 0x7d3   :  { %v794_v12 = vpop.permute.xlu0 %793 }
 0x7d4   :  { %v796_v14 = vmul.f32 %v794_v12, %v791_v11  ;;  %696 = vrot.lane.b32.xlu1 %v3381_v10, %s3116_s16 }
 0x7d6   :  { %v3386_v15 = vadd.f32 %v797_v13, %v796_v14 }
 0x7d8   :  { %800 = vrot.lane.b32.xlu0 %v3386_v15, %s3116_s16 }
 0x846   :  { %v697_v16 = vpop.permute.xlu1 %696 }
 0x847   :  { %700 = vst.msk [vmem:[#allocation11 + $0x4] sm:$0xf] %vm422_vm2, %v697_v16  ;;  %2662 = vmatmul.mubr.msk.f32.vlgmr.msra.gmra.mxu0 %vm126_vm1, %v697_v16 }
 0x848   :  { %2676 = vmatpush3.msra.mxu0 %v3238_v22  ;;  %2683 = vmatprep.mubr.msk.f32.mxu0 %vm3115_vm0, %v3114_v0 }
 0x849   :  { %2677 = vmatprep.subr.mxu0 %v3114_v0 }
 0x84a   :  { %v801_v17 = vpop.permute.xlu0 %800  ;;  %2678 = vmatpush3.msra.mxu0 %v3244_v24 }
 0x84b   :  { %2651 = vmatmul.mubr.msk.f32.vlgmr.msra.gmra.mxu1 %vm126_vm1, %v801_v17  ;;  %2679 = vmatprep.subr.mxu0 %v3114_v0 }
 0x84c   :  { %2665 = vmatpush3.msra.mxu1 %v3206_v1  ;;  %2672 = vmatprep.mubr.msk.f32.mxu1 %vm3115_vm0, %v3114_v0 }
 0x84d   :  { %2666 = vmatprep.subr.mxu1 %v3114_v0  ;;  %2680 = vmatpush3.msra.mxu0 %v3252_v27 }
 0x84e   :  { %2667 = vmatpush3.msra.mxu1 %v3208_v2  ;;  %2681 = vmatprep.subr.mxu0 %v3114_v0 }
 0x84f   :  { %2668 = vmatprep.subr.mxu1 %v3114_v0  ;;  %2682 = vmatpush3.msra.mxu0 %v3260_v29 }
 0x850   :  { %2669 = vmatpush3.msra.mxu1 %v3212_v3  ;;  %2697 = vmatprep.subr.mxu0 %v3114_v0 }
 0x851   :  { %2670 = vmatprep.subr.mxu1 %v3114_v0 }
 0x852   :  { %2671 = vmatpush3.msra.mxu1 %v3216_v4 }
 0x853   :  { %2673 = vmatmul.mubr.msk.f32.vlgmr.msra.gmra.mxu1 %vm126_vm1, %v801_v17  ;;  %2686 = vmatprep.subr.mxu1 %v3114_v0 }
 0x854   :  { %2687 = vmatpush3.msra.mxu1 %v3233_v20  ;;  %2694 = vmatprep.mubr.msk.f32.mxu1 %vm3115_vm0, %v3114_v0 }
 0x855   :  { %2688 = vmatprep.subr.mxu1 %v3114_v0 }
 0x856   :  { %2689 = vmatpush3.msra.mxu1 %v3235_v21 }
 0x857   :  { %2690 = vmatprep.subr.mxu1 %v3114_v0 }
 0x858   :  { %2691 = vmatpush3.msra.mxu1 %v3241_v23 }
 0x859   :  { %2692 = vmatprep.subr.mxu1 %v3114_v0 }
 0x85a   :  { %2693 = vmatpush3.msra.mxu1 %v3249_v26 }
 0x85b   :  { %2708 = vmatprep.subr.mxu1 %v3114_v0 }
 0x907   :  { %v942_v18 = vpop.f32.mrf.mxu0 }
 0x908   :  { %v943_v19 = vadd.f32 %v3288_v36, %v942_v18 }
 0x909   :  { %v2663_v25 = vpop.f32.mrf.mxu0 }
 0x90a   :  { %954 = vrot.lane.b32.xlu1 %v943_v19, %s3106_s12 }
 0x90b   :  { %v870_v30 = vpop.f32.mrf.mxu1 }
 0x90c   :  { %v871_v34 = vadd.f32 %v3317_v41, %v870_v30 }
 0x90d   :  { %v2652_v28 = vpop.f32.mrf.mxu1 }
 0x90e   :  { %v946_v35 = vadd.f32 %v943_v19, %v871_v34 }
 0x910   :  { %v2419_v37 = vmul.f32 -1.442695, %v946_v35 }
 0x912   :  { %2874 = vpow2.f32 %v2419_v37 }
 0x913   :  { %v1046_v31 = vpop.f32.mrf.mxu1 }
 0x914   :  { %v1047_v32 = vadd.f32 %v3228_v6, %v1046_v31  ;;  %v1256_v31 = vld [vmem:[#allocation2 + $0x10] sm:$0xf] }
 0x915   :  { %v2674_v33 = vpop.f32.mrf.mxu1 }
 0x916   :  { %1058 = vrot.lane.b32.xlu0 %v1047_v32, %s3106_s12  ;;  %v1050_v39 = vadd.f32 %v1047_v32, %v979_v38 }
 0x918   :  { %v2421_v40 = vmul.f32 -1.442695, %v1050_v39 }
 0x91a   :  { %2876 = vpow2.f32 %v2421_v40 }
 0x91f   :  { %v2875_v42 = vpop.eup %2874 }
 0x920   :  { %v950_v43 = vadd.f32 1.0, %v2875_v42 }
 0x922   :  { %2878 = vrcp.f32 %v950_v43 }
 0x927   :  { %v2877_v44 = vpop.eup %2876 }
 0x928   :  { %v1054_v45 = vadd.f32 1.0, %v2877_v44 }
 0x92a   :  { %2880 = vrcp.f32 %v1054_v45 }
 0x92f   :  { %v2879_v46 = vpop.eup %2878 }
 0x930   :  { %v964_v58 = vsub.f32 1.0, %v2879_v46  ;;  %v970_v60 = vmul.f32 %v2879_v46, %v3381_v10 }
 0x937   :  { %v2881_v49 = vpop.eup %2880 }
 0x938   :  { %v1068_v63 = vsub.f32 1.0, %v2881_v49  ;;  %v1074_v7 = vmul.f32 %v2881_v49, %v3386_v15 }
 0x97c   :  { %v955_v47 = vpop.permute.xlu1 %954 }
 0x97d   :  { %v957_v48 = vmul.f32 %v2879_v46, %v955_v47 }
 0x97f   :  { %959 = vrot.lane.b32.xlu1 %v957_v48, %s3106_s12 }
 0x988   :  { %v1059_v50 = vpop.permute.xlu0 %1058 }
 0x989   :  { %v1061_v51 = vmul.f32 %v2881_v49, %v1059_v50 }
 0x98b   :  { %1063 = vrot.lane.b32.xlu0 %v1061_v51, %s3106_s12 }
 0x9f1   :  { %v960_v52 = vpop.permute.xlu1 %959 }
 0x9f2   :  { %v962_v53 = vadd.f32 %v960_v52, %v871_v34 }
 0x9f4   :  { %2882 = vtanh.f32 %v962_v53 }
 0x9fd   :  { %v1064_v54 = vpop.permute.xlu0 %1063 }
 0x9fe   :  { %v1066_v55 = vadd.f32 %v1064_v54, %v979_v38 }
 0xa00   :  { %2884 = vtanh.f32 %v1066_v55 }
 0xa01   :  { %v2883_v56 = vpop.eup %2882 }
 0xa02   :  { %966 = vrot.lane.b32.xlu1 %v2883_v56, %s3116_s16 }
 0xa0d   :  { %v2885_v57 = vpop.eup %2884 }
 0xa0e   :  { %1070 = vrot.lane.b32.xlu0 %v2885_v57, %s3116_s16 }
 0xa74   :  { %v967_v59 = vpop.permute.xlu1 %966 }
 0xa75   :  { %v969_v61 = vmul.f32 %v967_v59, %v964_v58 }
 0xa77   :  { %v3434_v62 = vadd.f32 %v970_v60, %v969_v61 }
 0xa79   :  { %973 = vrot.lane.b32.xlu1 %v3434_v62, %s3116_s16 }
 0xa80   :  { %v1071_v5 = vpop.permute.xlu0 %1070 }
 0xa81   :  { %v1073_v8 = vmul.f32 %v1071_v5, %v1068_v63 }
 0xa83   :  { %v3439_v9 = vadd.f32 %v1074_v7, %v1073_v8 }
 0xa85   :  { %1077 = vrot.lane.b32.xlu0 %v3439_v9, %s3116_s16 }
 0xaeb   :  { %v974_v11 = vpop.permute.xlu1 %973 }
 0xaec   :  { %977 = vst.msk [vmem:[#allocation11 + $0x8] sm:$0xf] %vm422_vm2, %v974_v11  ;;  %2695 = vmatmul.mubr.msk.f32.vlgmr.msra.gmra.mxu1 %vm126_vm1, %v974_v11 }
 0xaed   :  { %2709 = vmatpush3.msra.mxu1 %v3238_v22  ;;  %2716 = vmatprep.mubr.msk.f32.mxu1 %vm3115_vm0, %v3114_v0 }
 0xaee   :  { %2710 = vmatprep.subr.mxu1 %v3114_v0 }
 0xaef   :  { %2711 = vmatpush3.msra.mxu1 %v3244_v24 }
 0xaf0   :  { %2712 = vmatprep.subr.mxu1 %v3114_v0 }
 0xaf1   :  { %2713 = vmatpush3.msra.mxu1 %v3252_v27 }
 0xaf2   :  { %2714 = vmatprep.subr.mxu1 %v3114_v0 }
 0xaf3   :  { %2715 = vmatpush3.msra.mxu1 %v3260_v29 }
 0xaf4   :  { %2730 = vmatprep.subr.mxu1 %v3114_v0 }
 0xaf7   :  { %v1078_v10 = vpop.permute.xlu0 %1077 }
 0xaf8   :  { %2684 = vmatmul.mubr.msk.f32.vlgmr.msra.gmra.mxu0 %vm126_vm1, %v1078_v10 }
 0xaf9   :  { %2698 = vmatpush3.msra.mxu0 %v3206_v1  ;;  %2705 = vmatprep.mubr.msk.f32.mxu0 %vm3115_vm0, %v3114_v0 }
 0xafa   :  { %2699 = vmatprep.subr.mxu0 %v3114_v0 }
 0xafb   :  { %2700 = vmatpush3.msra.mxu0 %v3208_v2 }
 0xafc   :  { %2701 = vmatprep.subr.mxu0 %v3114_v0 }
 0xafd   :  { %2702 = vmatpush3.msra.mxu0 %v3212_v3 }
 0xafe   :  { %2703 = vmatprep.subr.mxu0 %v3114_v0 }
 0xaff   :  { %2704 = vmatpush3.msra.mxu0 %v3216_v4 }
 0xb00   :  { %2706 = vmatmul.mubr.msk.f32.vlgmr.msra.gmra.mxu0 %vm126_vm1, %v1078_v10  ;;  %2719 = vmatprep.subr.mxu0 %v3114_v0 }
 0xb01   :  { %2720 = vmatpush3.msra.mxu0 %v3233_v20  ;;  %2727 = vmatprep.mubr.msk.f32.mxu0 %vm3115_vm0, %v3114_v0 }
 0xb02   :  { %2721 = vmatprep.subr.mxu0 %v3114_v0 }
 0xb03   :  { %2722 = vmatpush3.msra.mxu0 %v3235_v21 }
 0xb04   :  { %2723 = vmatprep.subr.mxu0 %v3114_v0 }
 0xb05   :  { %2724 = vmatpush3.msra.mxu0 %v3241_v23 }
 0xb06   :  { %2725 = vmatprep.subr.mxu0 %v3114_v0 }
 0xb07   :  { %2726 = vmatpush3.msra.mxu0 %v3249_v26 }
 0xb08   :  { %2741 = vmatprep.subr.mxu0 %v3114_v0 }
 0xbac   :  { %v1219_v12 = vpop.f32.mrf.mxu1 }
 0xbad   :  { %v1220_v13 = vadd.f32 %v3288_v36, %v1219_v12 }
 0xbae   :  { %v2696_v14 = vpop.f32.mrf.mxu1 }
 0xbaf   :  { %1231 = vrot.lane.b32.xlu0 %v1220_v13, %s3106_s12 }
 0xbb8   :  { %v1147_v15 = vpop.f32.mrf.mxu0 }
 0xbb9   :  { %v1148_v25 = vadd.f32 %v3317_v41, %v1147_v15  ;;  %v1533_v15 = vld [vmem:[#allocation2 + $0x14] sm:$0xf] }
 0xbba   :  { %v2685_v16 = vpop.f32.mrf.mxu0 }
 0xbbb   :  { %v1223_v30 = vadd.f32 %v1220_v13, %v1148_v25 }
 0xbbd   :  { %v2424_v28 = vmul.f32 -1.442695, %v1223_v30 }
 0xbbf   :  { %2886 = vpow2.f32 %v2424_v28 }
 0xbc0   :  { %v1323_v17 = vpop.f32.mrf.mxu0 }
 0xbc1   :  { %v1324_v18 = vadd.f32 %v3228_v6, %v1323_v17 }
 0xbc2   :  { %v2707_v19 = vpop.f32.mrf.mxu0 }
 0xbc3   :  { %1335 = vrot.lane.b32.xlu1 %v1324_v18, %s3106_s12  ;;  %v1327_v32 = vadd.f32 %v1324_v18, %v1256_v31 }
 0xbc5   :  { %v2426_v34 = vmul.f32 -1.442695, %v1327_v32 }
 0xbc7   :  { %2888 = vpow2.f32 %v2426_v34 }
 0xbcc   :  { %v2887_v33 = vpop.eup %2886 }
 0xbcd   :  { %v1227_v35 = vadd.f32 1.0, %v2887_v33 }
 0xbcf   :  { %2890 = vrcp.f32 %v1227_v35 }
 0xbd4   :  { %v2889_v37 = vpop.eup %2888 }
 0xbd5   :  { %v1331_v42 = vadd.f32 1.0, %v2889_v37 }
 0xbd7   :  { %2892 = vrcp.f32 %v1331_v42 }
 0xbdc   :  { %v2891_v38 = vpop.eup %2890 }
 0xbdd   :  { %v1241_v52 = vsub.f32 1.0, %v2891_v38  ;;  %v1247_v54 = vmul.f32 %v2891_v38, %v3434_v62 }
 0xbe4   :  { %v2893_v43 = vpop.eup %2892 }
 0xbe5   :  { %v1345_v57 = vsub.f32 1.0, %v2893_v43  ;;  %v1351_v59 = vmul.f32 %v2893_v43, %v3439_v9 }
 0xc21   :  { %v1232_v39 = vpop.permute.xlu0 %1231 }
 0xc22   :  { %v1234_v40 = vmul.f32 %v2891_v38, %v1232_v39 }
 0xc24   :  { %1236 = vrot.lane.b32.xlu0 %v1234_v40, %s3106_s12 }
 0xc35   :  { %v1336_v44 = vpop.permute.xlu1 %1335 }
 0xc36   :  { %v1338_v45 = vmul.f32 %v2893_v43, %v1336_v44 }
 0xc38   :  { %1340 = vrot.lane.b32.xlu1 %v1338_v45, %s3106_s12 }
 0xc96   :  { %v1237_v46 = vpop.permute.xlu0 %1236 }
 0xc97   :  { %v1239_v47 = vadd.f32 %v1237_v46, %v1148_v25 }
 0xc99   :  { %2894 = vtanh.f32 %v1239_v47 }
 0xca6   :  { %v2895_v48 = vpop.eup %2894 }
 0xca7   :  { %1243 = vrot.lane.b32.xlu0 %v2895_v48, %s3116_s16 }
 0xcaa   :  { %v1341_v49 = vpop.permute.xlu1 %1340 }
 0xcab   :  { %v1343_v50 = vadd.f32 %v1341_v49, %v1256_v31 }
 0xcad   :  { %2896 = vtanh.f32 %v1343_v50 }
 0xcba   :  { %v2897_v51 = vpop.eup %2896 }
 0xcbb   :  { %1347 = vrot.lane.b32.xlu1 %v2897_v51, %s3116_s16 }
 0xd19   :  { %v1244_v53 = vpop.permute.xlu0 %1243 }
 0xd1a   :  { %v1246_v55 = vmul.f32 %v1244_v53, %v1241_v52 }
 0xd1c   :  { %v3487_v56 = vadd.f32 %v1247_v54, %v1246_v55 }
 0xd1e   :  { %1250 = vrot.lane.b32.xlu0 %v3487_v56, %s3116_s16 }
 0xd2d   :  { %v1348_v58 = vpop.permute.xlu1 %1347 }
 0xd2e   :  { %v1350_v60 = vmul.f32 %v1348_v58, %v1345_v57 }
 0xd30   :  { %v3492_v61 = vadd.f32 %v1351_v59, %v1350_v60 }
 0xd32   :  { %1354 = vrot.lane.b32.xlu1 %v3492_v61, %s3116_s16 }
 0xd90   :  { %v1251_v63 = vpop.permute.xlu0 %1250 }
 0xd91   :  { %1254 = vst.msk [vmem:[#allocation11 + $0xc] sm:$0xf] %vm422_vm2, %v1251_v63  ;;  %2728 = vmatmul.mubr.msk.f32.vlgmr.msra.gmra.mxu0 %vm126_vm1, %v1251_v63  ;;  %v1810_v63 = vld [vmem:[#allocation2 + $0x18] sm:$0xf] }
 0xd92   :  { %2742 = vmatpush3.msra.mxu0 %v3238_v22  ;;  %2749 = vmatprep.mubr.msk.f32.mxu0 %vm3115_vm0, %v3114_v0 }
 0xd93   :  { %2743 = vmatprep.subr.mxu0 %v3114_v0 }
 0xd94   :  { %2744 = vmatpush3.msra.mxu0 %v3244_v24 }
 0xd95   :  { %2745 = vmatprep.subr.mxu0 %v3114_v0 }
 0xd96   :  { %2746 = vmatpush3.msra.mxu0 %v3252_v27 }
 0xd97   :  { %2747 = vmatprep.subr.mxu0 %v3114_v0 }
 0xd98   :  { %2748 = vmatpush3.msra.mxu0 %v3260_v29 }
 0xd99   :  { %2763 = vmatprep.subr.mxu0 %v3114_v0 }
 0xda4   :  { %v1355_v62 = vpop.permute.xlu1 %1354 }
 0xda5   :  { %2717 = vmatmul.mubr.msk.f32.vlgmr.msra.gmra.mxu1 %vm126_vm1, %v1355_v62 }
 0xda6   :  { %2731 = vmatpush3.msra.mxu1 %v3206_v1  ;;  %2738 = vmatprep.mubr.msk.f32.mxu1 %vm3115_vm0, %v3114_v0 }
 0xda7   :  { %2732 = vmatprep.subr.mxu1 %v3114_v0 }
 0xda8   :  { %2733 = vmatpush3.msra.mxu1 %v3208_v2 }
 0xda9   :  { %2734 = vmatprep.subr.mxu1 %v3114_v0 }
 0xdaa   :  { %2735 = vmatpush3.msra.mxu1 %v3212_v3 }
 0xdab   :  { %2736 = vmatprep.subr.mxu1 %v3114_v0 }
 0xdac   :  { %2737 = vmatpush3.msra.mxu1 %v3216_v4 }
 0xdad   :  { %2739 = vmatmul.mubr.msk.f32.vlgmr.msra.gmra.mxu1 %vm126_vm1, %v1355_v62  ;;  %2752 = vmatprep.subr.mxu1 %v3114_v0 }
 0xdae   :  { %2753 = vmatpush3.msra.mxu1 %v3233_v20  ;;  %2760 = vmatprep.mubr.msk.f32.mxu1 %vm3115_vm0, %v3114_v0 }
 0xdaf   :  { %2754 = vmatprep.subr.mxu1 %v3114_v0 }
 0xdb0   :  { %2755 = vmatpush3.msra.mxu1 %v3235_v21 }
 0xdb1   :  { %2756 = vmatprep.subr.mxu1 %v3114_v0 }
 0xdb2   :  { %2757 = vmatpush3.msra.mxu1 %v3241_v23 }
 0xdb3   :  { %2758 = vmatprep.subr.mxu1 %v3114_v0 }
 0xdb4   :  { %2759 = vmatpush3.msra.mxu1 %v3249_v26 }
 0xdb5   :  { %2774 = vmatprep.subr.mxu1 %v3114_v0 }
 0xe51   :  { %v1496_v1 = vpop.f32.mrf.mxu0 }
 0xe52   :  { %v1497_v2 = vadd.f32 %v3288_v36, %v1496_v1 }
 0xe53   :  { %v2729_v3 = vpop.f32.mrf.mxu0 }
 0xe54   :  { %1508 = vrot.lane.b32.xlu0 %v1497_v2, %s3106_s12 }
 0xe65   :  { %v1424_v4 = vpop.f32.mrf.mxu1 }
 0xe66   :  { %v1425_v11 = vadd.f32 %v3317_v41, %v1424_v4 }
 0xe67   :  { %v2718_v5 = vpop.f32.mrf.mxu1 }
 0xe68   :  { %v1500_v10 = vadd.f32 %v1497_v2, %v1425_v11 }
 0xe6a   :  { %v2429_v12 = vmul.f32 -1.442695, %v1500_v10 }
 0xe6c   :  { %2898 = vpow2.f32 %v2429_v12 }
 0xe6d   :  { %v1600_v7 = vpop.f32.mrf.mxu1 }
 0xe6e   :  { %v1601_v8 = vadd.f32 %v3228_v6, %v1600_v7 }
 0xe6f   :  { %v2740_v9 = vpop.f32.mrf.mxu1 }
 0xe70   :  { %1612 = vrot.lane.b32.xlu1 %v1601_v8, %s3106_s12  ;;  %v1604_v16 = vadd.f32 %v1601_v8, %v1533_v15 }
 0xe72   :  { %v2431_v17 = vmul.f32 -1.442695, %v1604_v16 }
 0xe79   :  { %v2899_v13 = vpop.eup %2898 }
 0xe7a   :  { %v1504_v14 = vadd.f32 1.0, %v2899_v13 }
 0xe7c   :  { %2900 = vrcp.f32 %v1504_v14 }
 0xe7d   :  { %2902 = vpow2.f32 %v2431_v17 }
 0xe89   :  { %v2901_v18 = vpop.eup %2900 }
 0xe8a   :  { %v2903_v6 = vpop.eup %2902  ;;  %v1518_v40 = vsub.f32 1.0, %v2901_v18  ;;  %v1524_v43 = vmul.f32 %v2901_v18, %v3487_v56 }
 0xe8b   :  { %v1608_v30 = vadd.f32 1.0, %v2903_v6 }
 0xe8d   :  { %2904 = vrcp.f32 %v1608_v30 }
 0xe9a   :  { %v2905_v28 = vpop.eup %2904 }
 0xe9b   :  { %v1622_v46 = vsub.f32 1.0, %v2905_v28  ;;  %v1628_v48 = vmul.f32 %v2905_v28, %v3492_v61 }
 0xec6   :  { %v1509_v19 = vpop.permute.xlu0 %1508 }
 0xec7   :  { %v1511_v25 = vmul.f32 %v2901_v18, %v1509_v19 }
 0xec9   :  { %1513 = vrot.lane.b32.xlu0 %v1511_v25, %s3106_s12 }
 0xee2   :  { %v1613_v31 = vpop.permute.xlu1 %1612 }
 0xee3   :  { %v1615_v32 = vmul.f32 %v2905_v28, %v1613_v31 }
 0xee5   :  { %1617 = vrot.lane.b32.xlu1 %v1615_v32, %s3106_s12 }
 0xf3b   :  { %v1514_v33 = vpop.permute.xlu0 %1513 }
 0xf3c   :  { %v1516_v34 = vadd.f32 %v1514_v33, %v1425_v11 }
 0xf3e   :  { %2906 = vtanh.f32 %v1516_v34  ;;  %v2945_v34 = vld [vmem:[#allocation8 + $0x18] sm:$0xff] }
 0xf4b   :  { %v2907_v35 = vpop.eup %2906 }
 0xf4c   :  { %1520 = vrot.lane.b32.xlu0 %v2907_v35, %s3116_s16  ;;  %v2946_v35 = vld [vmem:[#allocation8 + $0x10] sm:$0xff] }
 0xf57   :  { %v1618_v37 = vpop.permute.xlu1 %1617 }
 0xf58   :  { %v1620_v38 = vadd.f32 %v1618_v37, %v1533_v15  ;;  %v2947_v37 = vld [vmem:[#allocation8 + $0x8] sm:$0xff] }
 0xf5a   :  { %2908 = vtanh.f32 %v1620_v38  ;;  %v2948_v38 = vld [vmem:[#allocation8] sm:$0xff] }
 0xf67   :  { %v2909_v39 = vpop.eup %2908 }
 0xf68   :  { %1624 = vrot.lane.b32.xlu1 %v2909_v39, %s3116_s16 }
 0xfbe   :  { %v1521_v42 = vpop.permute.xlu0 %1520 }
 0xfbf   :  { %v1523_v44 = vmul.f32 %v1521_v42, %v1518_v40  ;;  %v2949_v40 = vld [vmem:[#allocation10 + $0x18] sm:$0xff]  ;;  %v2950_v42 = vld [vmem:[#allocation10 + $0x10] sm:$0xff] }
 0xfc1   :  { %v3540_v45 = vadd.f32 %v1524_v43, %v1523_v44  ;;  %v2951_v43 = vld [vmem:[#allocation10 + $0x8] sm:$0xff]  ;;  %v2952_v44 = vld [vmem:[#allocation10] sm:$0xff] }
 0xfc3   :  { %1527 = vrot.lane.b32.xlu0 %v3540_v45, %s3116_s16 }
 0xfda   :  { %v1625_v47 = vpop.permute.xlu1 %1624 }
 0xfdb   :  { %v1627_v49 = vmul.f32 %v1625_v47, %v1622_v46  ;;  %v2953_v46 = vld [vmem:[%s3685_s7] ss:$0 sm:$0xff] }
 0xfdd   :  { %v3545_v50 = vadd.f32 %v1628_v48, %v1627_v49 }
 0xfdf   :  { %1631 = vrot.lane.b32.xlu1 %v3545_v50, %s3116_s16 }
0x1035   :  { %v1528_v51 = vpop.permute.xlu0 %1527 }
0x1036   :  { %1531 = vst.msk [vmem:[#allocation11 + $0x10] sm:$0xf] %vm422_vm2, %v1528_v51  ;;  %2761 = vmatmul.mubr.msk.f32.vlgmr.msra.gmra.mxu1 %vm126_vm1, %v1528_v51 }
0x1037   :  { %2775 = vmatpush3.msra.mxu1 %v3238_v22  ;;  %2782 = vmatprep.mubr.msk.f32.mxu1 %vm3115_vm0, %v3114_v0  ;;  %v3562_v22 = vld [vmem:[#allocation7 + $0x18] sm:$0xff] }
0x1038   :  { %2776 = vmatprep.subr.mxu1 %v3114_v0 }
0x1039   :  { %2777 = vmatpush3.msra.mxu1 %v3244_v24  ;;  %v3568_v24 = vld [vmem:[#allocation7 + $0x10] sm:$0xff] }
0x103a   :  { %2778 = vmatprep.subr.mxu1 %v3114_v0 }
0x103b   :  { %2779 = vmatpush3.msra.mxu1 %v3252_v27  ;;  %v3572_v27 = vld [vmem:[#allocation7 + $0x8] sm:$0xff] }
0x103c   :  { %2780 = vmatprep.subr.mxu1 %v3114_v0 }
0x103d   :  { %2781 = vmatpush3.msra.mxu1 %v3260_v29  ;;  %v3576_v29 = vld [vmem:[#allocation7] sm:$0xff] }
0x103e   :  { %2796 = vmatprep.subr.mxu1 %v3114_v0 }
0x1051   :  { %v1632_v52 = vpop.permute.xlu1 %1631 }
0x1052   :  { %2750 = vmatmul.mubr.msk.f32.vlgmr.msra.gmra.mxu0 %vm126_vm1, %v1632_v52 }
0x1053   :  { %2764 = vmatpush3.msra.mxu0 %v3562_v22  ;;  %2771 = vmatprep.mubr.msk.f32.mxu0 %vm3115_vm0, %v3114_v0 }
0x1054   :  { %2765 = vmatprep.subr.mxu0 %v3114_v0 }
0x1055   :  { %2766 = vmatpush3.msra.mxu0 %v3568_v24 }
0x1056   :  { %2767 = vmatprep.subr.mxu0 %v3114_v0 }
0x1057   :  { %2768 = vmatpush3.msra.mxu0 %v3572_v27 }
0x1058   :  { %2769 = vmatprep.subr.mxu0 %v3114_v0 }
0x1059   :  { %2770 = vmatpush3.msra.mxu0 %v3576_v29 }
0x105a   :  { %2772 = vmatmul.mubr.msk.f32.vlgmr.msra.gmra.mxu0 %vm126_vm1, %v1632_v52  ;;  %2785 = vmatprep.subr.mxu0 %v3114_v0 }
0x105b   :  { %2786 = vmatpush3.msra.mxu0 %v3233_v20  ;;  %2793 = vmatprep.mubr.msk.f32.mxu0 %vm3115_vm0, %v3114_v0 }
0x105c   :  { %2787 = vmatprep.subr.mxu0 %v3114_v0 }
0x105d   :  { %2788 = vmatpush3.msra.mxu0 %v3235_v21  ;;  %v3596_v21 = vld [vmem:[%s3681_s3] ss:$0 sm:$0xff] }
0x105e   :  { %2789 = vmatprep.subr.mxu0 %v3114_v0 }
0x105f   :  { %2790 = vmatpush3.msra.mxu0 %v3241_v23 }
0x1060   :  { %2791 = vmatprep.subr.mxu0 %v3114_v0 }
0x1061   :  { %2792 = vmatpush3.msra.mxu0 %v3249_v26 }
0x1062   :  { %2807 = vmatprep.subr.mxu0 %v3114_v0 }
0x10f6   :  { %v1773_v53 = vpop.f32.mrf.mxu1 }
0x10f7   :  { %v1774_v20 = vadd.f32 %v3288_v36, %v1773_v53 }
0x10f8   :  { %v2762_v54 = vpop.f32.mrf.mxu1 }
0x10f9   :  { %1785 = vrot.lane.b32.xlu0 %v1774_v20, %s3106_s12 }
0x1112   :  { %v1701_v55 = vpop.f32.mrf.mxu0 }
0x1113   :  { %v1702_v26 = vadd.f32 %v3317_v41, %v1701_v55  ;;  %v2087_v55 = vld [vmem:[#allocation2 + $0x1c] sm:$0xf] }
0x1114   :  { %v2751_v56 = vpop.f32.mrf.mxu0 }
0x1115   :  { %v1777_v59 = vadd.f32 %v1774_v20, %v1702_v26 }
0x1117   :  { %v2434_v36 = vmul.f32 -1.442695, %v1777_v59 }
0x1119   :  { %2910 = vpow2.f32 %v2434_v36 }
0x111a   :  { %v1877_v57 = vpop.f32.mrf.mxu0 }
0x111b   :  { %v1878_v23 = vadd.f32 %v3596_v21, %v1877_v57 }
0x111c   :  { %v2773_v58 = vpop.f32.mrf.mxu0 }
0x111d   :  { %1889 = vrot.lane.b32.xlu1 %v1878_v23, %s3106_s12  ;;  %v1881_v62 = vadd.f32 %v1878_v23, %v1810_v63 }
0x111f   :  { %v2436_v1 = vmul.f32 -1.442695, %v1881_v62 }
0x1126   :  { %v2911_v60 = vpop.eup %2910 }
0x1127   :  { %v1781_v61 = vadd.f32 1.0, %v2911_v60 }
0x1129   :  { %2912 = vrcp.f32 %v1781_v61 }
0x112a   :  { %2914 = vpow2.f32 %v2436_v1 }
0x1136   :  { %v2913_v2 = vpop.eup %2912 }
0x1137   :  { %v2915_v5 = vpop.eup %2914  ;;  %v1795_v16 = vsub.f32 1.0, %v2913_v2  ;;  %v1801_v18 = vmul.f32 %v2913_v2, %v3540_v45 }
0x1138   :  { %v1885_v7 = vadd.f32 1.0, %v2915_v5 }
0x113a   :  { %2916 = vrcp.f32 %v1885_v7 }
0x1147   :  { %v2917_v8 = vpop.eup %2916 }
0x1148   :  { %v1899_v6 = vsub.f32 1.0, %v2917_v8  ;;  %v1905_v28 = vmul.f32 %v2917_v8, %v3545_v50 }
0x116b   :  { %v1786_v3 = vpop.permute.xlu0 %1785 }
0x116c   :  { %v1788_v4 = vmul.f32 %v2913_v2, %v1786_v3 }
0x116e   :  { %1790 = vrot.lane.b32.xlu0 %v1788_v4, %s3106_s12 }
0x118f   :  { %v1890_v41 = vpop.permute.xlu1 %1889 }
0x1190   :  { %v1892_v9 = vmul.f32 %v2917_v8, %v1890_v41 }
0x1192   :  { %1894 = vrot.lane.b32.xlu1 %v1892_v9, %s3106_s12 }
0x11e0   :  { %v1791_v11 = vpop.permute.xlu0 %1790 }
0x11e1   :  { %v1793_v10 = vadd.f32 %v1791_v11, %v1702_v26 }
0x11e3   :  { %2918 = vtanh.f32 %v1793_v10 }
0x11f0   :  { %v2919_v12 = vpop.eup %2918 }
0x11f1   :  { %1797 = vrot.lane.b32.xlu0 %v2919_v12, %s3116_s16 }
0x1204   :  { %v1895_v13 = vpop.permute.xlu1 %1894 }
0x1205   :  { %v1897_v14 = vadd.f32 %v1895_v13, %v1810_v63 }
0x1207   :  { %2920 = vtanh.f32 %v1897_v14 }
0x1214   :  { %v2921_v15 = vpop.eup %2920 }
0x1215   :  { %1901 = vrot.lane.b32.xlu1 %v2921_v15, %s3116_s16 }
0x1263   :  { %v1798_v17 = vpop.permute.xlu0 %1797 }
0x1264   :  { %v1800_v19 = vmul.f32 %v1798_v17, %v1795_v16 }
0x1266   :  { %v3606_v25 = vadd.f32 %v1801_v18, %v1800_v19 }
0x1268   :  { %1804 = vrot.lane.b32.xlu0 %v3606_v25, %s3116_s16 }
0x1287   :  { %v1902_v30 = vpop.permute.xlu1 %1901 }
0x1288   :  { %v1904_v31 = vmul.f32 %v1902_v30, %v1899_v6 }
0x128a   :  { %v3611_v32 = vadd.f32 %v1905_v28, %v1904_v31 }
0x128c   :  { %1908 = vrot.lane.b32.xlu1 %v3611_v32, %s3116_s16 }
0x12da   :  { %v1805_v33 = vpop.permute.xlu0 %1804 }
0x12db   :  { %1808 = vst.msk [vmem:[#allocation11 + $0x14] sm:$0xf] %vm422_vm2, %v1805_v33  ;;  %2794 = vmatmul.mubr.msk.f32.vlgmr.msra.gmra.mxu0 %vm126_vm1, %v1805_v33 }
0x12dc   :  { %2808 = vmatpush3.msra.mxu0 %v2945_v34  ;;  %2815 = vmatprep.mubr.msk.f32.mxu0 %vm3115_vm0, %v3114_v0 }
0x12dd   :  { %2809 = vmatprep.subr.mxu0 %v3114_v0 }
0x12de   :  { %2810 = vmatpush3.msra.mxu0 %v2946_v35 }
0x12df   :  { %2811 = vmatprep.subr.mxu0 %v3114_v0 }
0x12e0   :  { %2812 = vmatpush3.msra.mxu0 %v2947_v37 }
0x12e1   :  { %2813 = vmatprep.subr.mxu0 %v3114_v0 }
0x12e2   :  { %2814 = vmatpush3.msra.mxu0 %v2948_v38 }
0x12fe   :  { %v1909_v39 = vpop.permute.xlu1 %1908 }
0x12ff   :  { %2783 = vmatmul.mubr.msk.f32.vlgmr.msra.gmra.mxu1 %vm126_vm1, %v1909_v39 }
0x1300   :  { %2797 = vmatpush3.msra.mxu1 %v3562_v22  ;;  %2804 = vmatprep.mubr.msk.f32.mxu1 %vm3115_vm0, %v3114_v0 }
0x1301   :  { %2798 = vmatprep.subr.mxu1 %v3114_v0 }
0x1302   :  { %2799 = vmatpush3.msra.mxu1 %v3568_v24 }
0x1303   :  { %2800 = vmatprep.subr.mxu1 %v3114_v0 }
0x1304   :  { %2801 = vmatpush3.msra.mxu1 %v3572_v27 }
0x1305   :  { %2802 = vmatprep.subr.mxu1 %v3114_v0 }
0x1306   :  { %2803 = vmatpush3.msra.mxu1 %v3576_v29 }
0x1307   :  { %2805 = vmatmul.mubr.msk.f32.vlgmr.msra.gmra.mxu1 %vm126_vm1, %v1909_v39  ;;  %2818 = vmatprep.subr.mxu1 %v3114_v0 }
0x1308   :  { %2819 = vmatpush3.msra.mxu1 %v2949_v40  ;;  %2826 = vmatprep.mubr.msk.f32.mxu1 %vm3115_vm0, %v3114_v0 }
0x1309   :  { %2820 = vmatprep.subr.mxu1 %v3114_v0 }
0x130a   :  { %2821 = vmatpush3.msra.mxu1 %v2950_v42 }
0x130b   :  { %2822 = vmatprep.subr.mxu1 %v3114_v0 }
0x130c   :  { %2823 = vmatpush3.msra.mxu1 %v2951_v43 }
0x130d   :  { %2824 = vmatprep.subr.mxu1 %v3114_v0  ;;  %v2954_v0 = vld [vmem:[%s3683_s5] ss:$0 sm:$0xff]  ;;  %s3118_s5 = smov [#allocation11]  }
0x130e   :  { %2825 = vmatpush3.msra.mxu1 %v2952_v44  ;;  %s2372_s7 = sshll.u32 %s3118_s5, 4  ;;  %s2373_s7 = int_to_ptr.vmem [resolvable:$true] %s2372_s7 }
0x130f   :  { %s3055_s28 = scalar_lea.vmem %s2373_s7, 512  ;;  %p3060_p12 = scmp.lt.s32.totalorder %s2373_s7, %s2373_s7 }
0x1310   :  { %p3056_p11 = scmp.ne.s32.totalorder %s2373_s7, %s3055_s28  ;;  %p3061_p13 = scmp.lt.s32.totalorder %s3055_s28, %s3055_s28 }
0x1312   :  { %p3062_p0 = por %p3061_p13, %p3060_p12 }
0x1314   :  { %p3063_p1 = pnand %p3062_p0, %p3056_p11 }
0x139b   :  { %v2050_v45 = vpop.f32.mrf.mxu0 }
0x139c   :  { %v2051_v47 = vadd.f32 %v2953_v46, %v2050_v45 }
0x139d   :  { %v2795_v48 = vpop.f32.mrf.mxu0 }
0x139e   :  { %2062 = vrot.lane.b32.xlu0 %v2051_v47, %s3106_s12 }
0x13bf   :  { %v1978_v49 = vpop.f32.mrf.mxu1 }
0x13c0   :  { %v1979_v24 = vadd.f32 %v2954_v0, %v1978_v49 }
0x13c1   :  { %v2784_v50 = vpop.f32.mrf.mxu1 }
0x13c2   :  { %v2054_v27 = vadd.f32 %v2051_v47, %v1979_v24 }
0x13c4   :  { %v2439_v29 = vmul.f32 -1.442695, %v2054_v27 }
0x13c6   :  { %2922 = vpow2.f32 %v2439_v29 }
0x13c7   :  { %v2154_v51 = vpop.f32.mrf.mxu1 }
0x13c8   :  { %v2155_v52 = vadd.f32 %v3596_v21, %v2154_v51 }
0x13c9   :  { %v2806_v22 = vpop.f32.mrf.mxu1 }
0x13ca   :  { %2166 = vrot.lane.b32.xlu1 %v2155_v52, %s3106_s12  ;;  %v2158_v23 = vadd.f32 %v2155_v52, %v2087_v55 }
0x13cc   :  { %v2441_v21 = vmul.f32 -1.442695, %v2158_v23 }
0x13d3   :  { %v2923_v53 = vpop.eup %2922 }
0x13d4   :  { %v2058_v20 = vadd.f32 1.0, %v2923_v53 }
0x13d6   :  { %2924 = vrcp.f32 %v2058_v20 }
0x13d7   :  { %2926 = vpow2.f32 %v2441_v21 }
0x13e3   :  { %v2925_v54 = vpop.eup %2924 }
0x13e4   :  { %v2927_v58 = vpop.eup %2926  ;;  %v2072_v4 = vsub.f32 1.0, %v2925_v54  ;;  %v2078_v7 = vmul.f32 %v2925_v54, %v3606_v25 }
0x13e5   :  { %v2162_v26 = vadd.f32 1.0, %v2927_v58 }
0x13e7   :  { %2928 = vrcp.f32 %v2162_v26 }
0x13f4   :  { %v2929_v59 = vpop.eup %2928 }
0x13f5   :  { %v2176_v9 = vsub.f32 1.0, %v2929_v59  ;;  %v2182_v10 = vmul.f32 %v2929_v59, %v3611_v32 }
0x1410   :  { %v2063_v56 = vpop.permute.xlu0 %2062 }
0x1411   :  { %v2065_v57 = vmul.f32 %v2925_v54, %v2063_v56 }
0x1413   :  { %2067 = vrot.lane.b32.xlu0 %v2065_v57, %s3106_s12 }
0x143c   :  { %v2167_v36 = vpop.permute.xlu1 %2166 }
0x143d   :  { %v2169_v60 = vmul.f32 %v2929_v59, %v2167_v36 }
0x143f   :  { %2171 = vrot.lane.b32.xlu1 %v2169_v60, %s3106_s12 }
0x1485   :  { %v2068_v61 = vpop.permute.xlu0 %2067 }
0x1486   :  { %v2070_v63 = vadd.f32 %v2068_v61, %v1979_v24 }
0x1488   :  { %2930 = vtanh.f32 %v2070_v63 }
0x1495   :  { %v2931_v62 = vpop.eup %2930 }
0x1496   :  { %2074 = vrot.lane.b32.xlu0 %v2931_v62, %s3116_s16 }
0x14b1   :  { %v2172_v1 = vpop.permute.xlu1 %2171 }
0x14b2   :  { %v2174_v2 = vadd.f32 %v2172_v1, %v2087_v55 }
0x14b4   :  { %2932 = vtanh.f32 %v2174_v2 }
0x14c1   :  { %v2933_v3 = vpop.eup %2932 }
0x14c2   :  { %2178 = vrot.lane.b32.xlu1 %v2933_v3, %s3116_s16 }
0x1508   :  { %v2075_v5 = vpop.permute.xlu0 %2074 }
0x1509   :  { %v2077_v8 = vmul.f32 %v2075_v5, %v2072_v4 }
0x150b   :  { %v2079_v41 = vadd.f32 %v2078_v7, %v2077_v8 }
0x150d   :  { %2081 = vrot.lane.b32.xlu0 %v2079_v41, %s3116_s16 }
0x1534   :  { %v2179_v11 = vpop.permute.xlu1 %2178 }
0x1535   :  { %v2181_v12 = vmul.f32 %v2179_v11, %v2176_v9 }
0x1537   :  { %v2183_v13 = vadd.f32 %v2182_v10, %v2181_v12 }
0x1539   :  { %2185 = vrot.lane.b32.xlu1 %v2183_v13, %s3116_s16 }
0x157f   :  { %v2082_v14 = vpop.permute.xlu0 %2081 }
0x1580   :  { %2085 = vst.msk [vmem:[#allocation11 + $0x18] sm:$0xf] %vm422_vm2, %v2082_v14  ;;  %2827 = vmatmul.mubr.msk.f32.vlgmr.msra.gmra.mxu1 %vm126_vm1, %v2082_v14 }
0x15ab   :  { %v2186_v15 = vpop.permute.xlu1 %2185 }
0x15ac   :  { %2364 = vst.msk [vmem:[#allocation12] sm:$0xf] %vm422_vm2, %v2186_v15  ;;  %2816 = vmatmul.mubr.msk.f32.vlgmr.msra.gmra.mxu0 %vm126_vm1, %v2186_v15 }
0x1640   :  { %v2327_v16 = vpop.f32.mrf.mxu1 }
0x1641   :  { %v2328_v17 = vadd.f32 %v2953_v46, %v2327_v16 }
0x1642   :  { %v2828_v18 = vpop.f32.mrf.mxu1 }
0x1643   :  { %2339 = vrot.lane.b32.xlu0 %v2328_v17, %s3106_s12 }
0x166c   :  { %v2255_v19 = vpop.f32.mrf.mxu0 }
0x166d   :  { %v2256_v6 = vadd.f32 %v2954_v0, %v2255_v19 }
0x166e   :  { %v2817_v25 = vpop.f32.mrf.mxu0 }
0x166f   :  { %v2331_v30 = vadd.f32 %v2328_v17, %v2256_v6 }
0x1671   :  { %v2444_v28 = vmul.f32 -1.442695, %v2331_v30 }
0x1673   :  { %2934 = vpow2.f32 %v2444_v28 }
0x1680   :  { %v2935_v31 = vpop.eup %2934 }
0x1681   :  { %v2335_v32 = vadd.f32 1.0, %v2935_v31 }
0x1683   :  { %2936 = vrcp.f32 %v2335_v32 }
0x1690   :  { %v2937_v33 = vpop.eup %2936 }
0x1691   :  { %v2349_v40 = vsub.f32 1.0, %v2937_v33  ;;  %v2355_v43 = vmul.f32 %v2937_v33, %v2079_v41 }
0x16b5   :  { %v2340_v34 = vpop.permute.xlu0 %2339 }
0x16b6   :  { %v2342_v35 = vmul.f32 %v2937_v33, %v2340_v34 }
0x16b8   :  { %2344 = vrot.lane.b32.xlu1 %v2342_v35, %s3106_s12 }
0x172a   :  { %v2345_v37 = vpop.permute.xlu1 %2344 }
0x172b   :  { %v2347_v38 = vadd.f32 %v2345_v37, %v2256_v6 }
0x172d   :  { %2938 = vtanh.f32 %v2347_v38 }
0x173a   :  { %v2939_v39 = vpop.eup %2938 }
0x173b   :  { %2351 = vrot.lane.b32.xlu0 %v2939_v39, %s3116_s16 }
0x17ad   :  { %v2352_v42 = vpop.permute.xlu0 %2351 }
0x17ae   :  { %v2354_v44 = vmul.f32 %v2352_v42, %v2349_v40 }
0x17b0   :  { %v2356_v45 = vadd.f32 %v2355_v43, %v2354_v44 }
0x17b2   :  { %2358 = vrot.lane.b32.xlu1 %v2356_v45, %s3116_s16 }
0x1824   :  { %v2359_v46 = vpop.permute.xlu1 %2358 }
0x1825   :  { %2362 = vst.msk [vmem:[#allocation11 + $0x1c] sm:$0xf] %vm422_vm2, %v2359_v46  ;;  %2366 = vst.msk [vmem:[#allocation12 + $0x4] sm:$0xf] %vm422_vm2, %v2359_v46 }
0x1826   :  { %3066 = shalt.err (!%p3063_p1)
}
0x1827   :  { %2378 = dma.vmem_to_hbm [thread:$0]  %s2373_s7, 512, %s3686_s8, [#allocation4], %s3106_s12, %s3106_s12, %s3107_s13  }
0x1828   :  { %s3075_s30 = scalar_lea.vmem %s2385_s27, 128  ;;  %p3080_p3 = scmp.lt.s32.totalorder %s2385_s27, %s2385_s27 }
0x1829   :  { %p3076_p2 = scmp.ne.s32.totalorder %s2385_s27, %s3075_s30  ;;  %p3081_p4 = scmp.lt.s32.totalorder %s3075_s30, %s3075_s30 }
0x182b   :  { %p3082_p5 = por %p3081_p4, %p3080_p3 }
0x182d   :  { %p3083_p6 = pnand %p3082_p5, %p3076_p2 }
0x182f   :  { %3086 = shalt.err (!%p3083_p6)
}
0x1830   :  { %2390 = dma.vmem_to_hbm [thread:$0]  %s2385_s27, 128, %s3687_s9, [#allocation13], %s3106_s12, %s3106_s12, %s3107_s13  }
0x1831   :  { %3101 = dma.done.wait [#allocation4], 512  }
0x1832   :  { %3102 = vsyncadd [#allocation4], 4294966784 }
0x1833   :  { %3103 = dma.done.wait [#allocation13], 128  }
0x1834   :  { %3104 = vsyncadd [#allocation13], 4294967168 }
0x1835   :  { %2397 = vsyncpa [#allocation3], 1 }
0x1836   :  { %2398 = vsyncpa [#allocation6], 1 }
0x1837   :  { %2399 = vsyncpa [#allocation9], 1 }
0x1838   :  { %2400 = vsyncpa [#allocation4], 1 }
0x1839   :  { %2401 = vsyncpa [#allocation13], 1 }

</bundles_post_ra>
